<compile_context>
chip_gen: v7x
topology: tpu7x:2x2x1
jax: 0.10.0
libtpu: 0.0.40
codegen_flags: <defaults>
</compile_context>

<pallas_src>
import functools

import numpy as np
import jax
import jax.numpy as jnp
from jax import lax
from jax.experimental import pallas as pl
from jax.experimental.pallas import tpu as pltpu


def cnn2d_kernel(patches_ref, stats_ref, wbd_ref, wstats_ref, wfc_ref, sel_ref,
                 bias_ref, out_ref, *, n_windows, pairs_per_step, num_classes, eps):
    bbp, nw, k_cls = pairs_per_step, n_windows, num_classes
    wbd = wbd_ref[...]                                    # [8, 128] bf16 block-diag taps

    # --- InstanceNorm2d statistics over all P conv positions, from sufficient stats.
    #     stats rows 0:BBP carry per-pair tap sums, rows BBP:2*BBP carry tap Gram
    #     entries; wstats folds the block-diagonal conv taps, their pairwise products
    #     and 1/P, so one f32 MXU matmul yields [mean ; E[x^2]] for every pair.
    stat = jnp.dot(stats_ref[0], wstats_ref[...], preferred_element_type=jnp.float32)
    mean = stat[:bbp]                                                   # [BBP, 128]
    inv_std = lax.rsqrt(stat[bbp:] - mean * mean + eps)                 # biased var (PyTorch)

    # --- Per-pair pipeline: tap-chunked conv with a running max (== MaxPool2d; valid
    #     because normalize+ReLU are monotone per channel), normalize, ReLU, fc
    #     multiply + window reduction.  Processing one pair (NW rows) at a time keeps
    #     live state small instead of spilling a [BBP*4*NW, 128] conv slab.
    red_rows = []
    for p in range(bbp):
        lo = p * nw
        pooled = jnp.dot(patches_ref[0, 0, pl.ds(lo, nw), :], wbd,
                         preferred_element_type=jnp.float32)            # [NW, 128]
        for g in (1, 2, 3):                                              # remaining pool taps
            pooled = jnp.maximum(
                pooled,
                jnp.dot(patches_ref[0, g, pl.ds(lo, nw), :], wbd,
                        preferred_element_type=jnp.float32))
        # Normalize + ReLU.  Dropout(0.3) is identity at inference time.
        # TODO(synk): training-mode dropout randomness is not replicated.
        act = jnp.maximum((pooled - mean[p:p + 1, :]) * inv_std[p:p + 1, :], 0.0)
        for k in range(k_cls):                       # K==1: single fused multiply+reduce
            red_rows.append(jnp.sum(act * wfc_ref[k], axis=0, keepdims=True))  # [1, 128]

    red = jnp.concatenate(red_rows, axis=0)                              # [BBP*K, 128]
    # Fold each 64-lane image half into its logit lane (0 / 64) -> lane-dense slab.
    out_ref[0] = (jnp.dot(red, sel_ref[...], preferred_element_type=jnp.float32)
                  + bias_ref[...])


def cnn2d_forward(x, params, num_classes=1, images_per_step=16):
    wconv, bconv, wfc, bfc = params          # [Cout,1,2,2], [Cout], [K, Cout*Hp*Wp], [K]
    del bconv  # cancels exactly under InstanceNorm (mean subtraction; var shift-invariant)

    B, Cin, H, W = x.shape
    Cout = wconv.shape[0]
    assert Cin == 1 and Cout == 64, "module is fixed at Conv2d(1, 64, k=2, p=1)"
    assert images_per_step % 2 == 0 and B % images_per_step == 0
    Hc, Wc = H + 1, W + 1                    # conv output size (k=2, pad=1, stride=1)
    Hp, Wp = Hc // 2, Wc // 2                # maxpool output size
    P, NW = Hc * Wc, Hp * Wp
    BBP = images_per_step // 2               # image pairs per grid step
    NPAIR = B // 2
    NB = NPAIR // BBP                        # grid size (keep >= 2 so v7x's 2 TCs both work)
    LANES = 2 * Cout                         # 128: two images packed on the lane axis
    K = num_classes

    x = x.astype(jnp.float32)
    xpad = jnp.pad(x[:, 0], ((0, 0), (1, 1), (1, 1)))                 # [B, H+2, W+2]

    # --- InstanceNorm sufficient statistics over ALL Hc*Wc conv positions (f32).
    views = jnp.stack([xpad[:, ki:ki + Hc, kj:kj + Wc]
                       for ki in (0, 1) for kj in (0, 1)], axis=1)    # [B, 4, Hc, Wc]
    s = jnp.sum(views, axis=(2, 3))                                   # [B, 4]
    gram = jnp.sum(views[:, :, None] * views[:, None, :], axis=(3, 4))  # [B, 4, 4]

    # --- im2col of the pooled region via static strided slices (no gather).
    #     Pool tap g = 2*di+dj, pool window n = oi*Wp+oj, conv tap t = 2*ki+kj.
    groups = []
    for di in (0, 1):
        for dj in (0, 1):
            taps = [xpad[:, di + ki: di + ki + 2 * Hp: 2,
                         dj + kj: dj + kj + 2 * Wp: 2]                # [B, Hp, Wp]
                    for ki in (0, 1) for kj in (0, 1)]
            groups.append(jnp.stack(taps, axis=-1).reshape(B, NW, 4))
    patches = jnp.stack(groups, axis=1)                               # [B, 4, NW, 4]

    # --- Pack consecutive image pairs side by side on the lane axis, then group into
    #     grid blocks with POOL-TAP-MAJOR rows (so each tap is a contiguous slice).
    patches = patches.reshape(NPAIR, 2, 4, NW, 4)
    patches = jnp.transpose(patches, (0, 2, 3, 1, 4)).reshape(NPAIR, 4, NW, 8)
    patches = (patches.reshape(NB, BBP, 4, NW, 8)
                      .transpose(0, 2, 1, 3, 4)
                      .reshape(NB, 4, BBP * NW, 8)
                      .astype(jnp.bfloat16))                          # bf16 MXU input

    # --- Merged, lane-dense stats input [NB, 2*BBP, 128]:
    #     rows 0:BBP -> tap sums (lanes 0:8); rows BBP:2*BBP -> Gram entries (lanes 8:40).
    s_pair = s.reshape(NPAIR, 8)
    g_pair = gram.reshape(NPAIR, 32)
    stats = jnp.zeros((NPAIR, 2, LANES), jnp.float32)
    stats = stats.at[:, 0, 0:8].set(s_pair).at[:, 1, 8:40].set(g_pair)
    stats = (stats.reshape(NB, BBP, 2, LANES)
                  .transpose(0, 2, 1, 3)
                  .reshape(NB, 2 * BBP, LANES))

    # --- Parameter repack (glue): block-diagonal weights implement the lane packing.
    w = jnp.transpose(wconv.reshape(Cout, 4), (1, 0))                 # [4, Cout]
    w_bd = jnp.zeros((8, LANES), jnp.float32)
    w_bd = w_bd.at[:4, :Cout].set(w).at[4:, Cout:].set(w)             # [8, 128]
    ww = (w[:, None, :] * w[None, :, :]).reshape(16, Cout)            # w[t]*w[u] pairs
    ww_bd = jnp.zeros((32, LANES), jnp.float32)
    ww_bd = ww_bd.at[:16, :Cout].set(ww).at[16:, Cout:].set(ww)       # [32, 128]

    # Single combined stats weight matrix (f32), with 1/P folded in.
    inv_p = 1.0 / float(P)
    w_stats = jnp.zeros((LANES, LANES), jnp.float32)
    w_stats = w_stats.at[0:8, :].set(w_bd * inv_p).at[8:40, :].set(ww_bd * inv_p)

    w_bd16 = w_bd.astype(jnp.bfloat16)                                # bf16 MXU input

    # PyTorch x.view(B,-1) flattens (C, oi, oj); reorder fc weights to (window, C)
    # and duplicate across both packed-image lane halves (kept in f32).
    wfc_r = jnp.transpose(wfc.reshape(K, Cout, Hp, Wp),
                          (0, 2, 3, 1)).reshape(K, NW, Cout)
    wfc_dup = jnp.concatenate([wfc_r, wfc_r], axis=-1).astype(jnp.float32)  # [K, NW, 128]

    # Selector folding each 64-lane half into one lane (lane 0 / lane Cout).
    sel_np = np.zeros((LANES, LANES), np.float32)
    sel_np[:Cout, 0] = 1.0
    sel_np[Cout:, Cout] = 1.0
    sel = jnp.asarray(sel_np)

    bias_rows = jnp.tile(bfc.astype(jnp.float32), (BBP,))             # row r -> class r % K
    bias_slab = jnp.zeros((BBP * K, LANES), jnp.float32)
    bias_slab = bias_slab.at[:, 0].set(bias_rows).at[:, Cout].set(bias_rows)

    kernel = functools.partial(cnn2d_kernel, n_windows=NW, pairs_per_step=BBP,
                               num_classes=K, eps=1e-5)

    # Per-step working set (double-buffered patches + small weights + output) is
    # well under 2 MiB, so the explicit 32 MiB cap is v7x-safe with huge headroom.
    out = pl.pallas_call(
        kernel,
        out_shape=jax.ShapeDtypeStruct((NB, BBP * K, LANES), jnp.float32),
        grid=(NB,),
        in_specs=[
            pl.BlockSpec((1, 4, BBP * NW, 8), lambda i: (i, 0, 0, 0)),  # pooled patches (bf16)
            pl.BlockSpec((1, 2 * BBP, LANES), lambda i: (i, 0, 0)),     # merged stats (f32)
            pl.BlockSpec((8, LANES), lambda i: (0, 0)),                 # conv W (blockdiag, bf16)
            pl.BlockSpec((LANES, LANES), lambda i: (0, 0)),             # stats weights (f32)
            pl.BlockSpec((K, NW, LANES), lambda i: (0, 0, 0)),          # fc weights (dup, f32)
            pl.BlockSpec((LANES, LANES), lambda i: (0, 0)),             # half-fold selector
            pl.BlockSpec((BBP * K, LANES), lambda i: (0, 0)),           # fc bias slab
        ],
        out_specs=pl.BlockSpec((1, BBP * K, LANES), lambda i: (i, 0, 0)),
        compiler_params=pltpu.CompilerParams(
            dimension_semantics=("parallel",),
            vmem_limit_bytes=32 * 1024 * 1024),
    )(patches, stats, w_bd16, w_stats, wfc_dup, sel, bias_slab)

    # Unpack: row = pair*K + class; lane 0 / lane Cout hold the two images of the pair.
    o = out.reshape(NPAIR, K, LANES)
    logits = jnp.stack([o[..., 0], o[..., Cout]], axis=1)             # [NPAIR, 2, K]
    return logits.reshape(B, K)


def reference_forward(x, params):
    """Pure-JAX reference with identical (eval-mode) semantics to the PyTorch module."""
    wconv, bconv, wfc, bfc = params
    conv = lax.conv_general_dilated(
        x, wconv, window_strides=(1, 1), padding=((1, 1), (1, 1)),
        dimension_numbers=("NCHW", "OIHW", "NCHW")) + bconv.reshape(1, -1, 1, 1)
    mean = conv.mean(axis=(2, 3), keepdims=True)
    var = conv.var(axis=(2, 3), keepdims=True)
    h = jnp.maximum((conv - mean) * lax.rsqrt(var + 1e-5), 0.0)
    B, C, Hc, Wc = h.shape
    Hp, Wp = Hc // 2, Wc // 2
    pooled = h[:, :, :2 * Hp, :2 * Wp].reshape(B, C, Hp, 2, Wp, 2).max(axis=(3, 5))
    flat = pooled.reshape(B, -1)
    return flat @ wfc.T + bfc


if __name__ == "__main__":
    B, H, W = 32, 16, 16
    Cout, num_classes = 64, 1
    Hp, Wp = (H + 1) // 2, (W + 1) // 2
    cnn_out_size = Cout * Hp * Wp            # 64 * 8 * 8 = 4096

    key = jax.random.PRNGKey(0)
    k1, k2, k3, k4, k5 = jax.random.split(key, 5)
    wconv = jax.random.normal(k1, (Cout, 1, 2, 2), jnp.float32) * 0.5
    bconv = jax.random.normal(k2, (Cout,), jnp.float32) * 0.1
    wfc = jax.random.normal(k3, (num_classes, cnn_out_size), jnp.float32) / np.sqrt(cnn_out_size)
    bfc = jax.random.normal(k4, (num_classes,), jnp.float32) * 0.1
    params = (wconv, bconv, wfc, bfc)

    x = jax.random.normal(k5, (B, 1, H, W), jnp.float32)

    out = jax.block_until_ready(cnn2d_forward(x, params, num_classes, images_per_step=16))
    ref = jax.block_until_ready(reference_forward(x, params))

    assert out.shape == (B, num_classes)
    # Tolerance reflects bf16 conv inputs on the MXU (f32 accumulation); the whole
    # InstanceNorm statistics path is kept in f32 as required for the variance identity.
    np.testing.assert_allclose(np.asarray(out), np.asarray(ref), rtol=2e-2, atol=2e-2)
    print("KERNEL_OK")
</pallas_src>

<mosaic_0001>
module attributes {stable_mosaic.version = 11 : i64} {
  func.func @cnn2d_kernel(%arg0: i32, %arg1: memref<1x4x512x8xbf16, #tpu.memory_space<vmem>>, %arg2: memref<1x16x128xf32, #tpu.memory_space<vmem>>, %arg3: memref<8x128xbf16, #tpu.memory_space<vmem>>, %arg4: memref<128x128xf32, #tpu.memory_space<vmem>>, %arg5: memref<1x64x128xf32, #tpu.memory_space<vmem>>, %arg6: memref<128x128xf32, #tpu.memory_space<vmem>>, %arg7: memref<8x128xf32, #tpu.memory_space<vmem>>, %arg8: memref<1x8x128xf32, #tpu.memory_space<vmem>>) attributes {dimension_semantics = [#tpu.dimension_semantics<parallel>], iteration_bounds = array<i64: 2>, scalar_prefetch = 0 : i64, scratch_operands = 0 : i64, tpu.core_type = #tpu.core_type<tc>, window_params = [{transform_indices = @transform_0, window_bounds = array<i64: 1, 4, 512, 8>}, {transform_indices = @transform_1, window_bounds = array<i64: 1, 16, 128>}, {pipeline_mode = #tpu.pipeline_mode<synchronous>, transform_indices = @transform_2, window_bounds = array<i64: 8, 128>}, {pipeline_mode = #tpu.pipeline_mode<synchronous>, transform_indices = @transform_3, window_bounds = array<i64: 128, 128>}, {pipeline_mode = #tpu.pipeline_mode<synchronous>, transform_indices = @transform_4, window_bounds = array<i64: 1, 64, 128>}, {pipeline_mode = #tpu.pipeline_mode<synchronous>, transform_indices = @transform_5, window_bounds = array<i64: 128, 128>}, {pipeline_mode = #tpu.pipeline_mode<synchronous>, transform_indices = @transform_6, window_bounds = array<i64: 8, 128>}, {transform_indices = @transform_7, window_bounds = array<i64: 1, 8, 128>}]} {
    %c0 = arith.constant 0 : index
    %c0_0 = arith.constant 0 : index
    %0 = vector.load %arg3[%c0, %c0_0] : memref<8x128xbf16, #tpu.memory_space<vmem>>, vector<8x128xbf16>
    %c0_1 = arith.constant 0 : index
    %c0_2 = arith.constant 0 : index
    %c0_3 = arith.constant 0 : index
    %1 = vector.load %arg2[%c0_1, %c0_2, %c0_3] : memref<1x16x128xf32, #tpu.memory_space<vmem>>, vector<1x16x128xf32>
    %2 = vector.shape_cast %1 : vector<1x16x128xf32> to vector<16x128xf32>
    %c0_4 = arith.constant 0 : index
    %c0_5 = arith.constant 0 : index
    %3 = vector.load %arg4[%c0_4, %c0_5] : memref<128x128xf32, #tpu.memory_space<vmem>>, vector<128x128xf32>
    %cst = arith.constant dense<0.000000e+00> : vector<16x128xf32>
    %4 = tpu.matmul %2, %3, %cst {dimension_numbers = #tpu.dot_dimension_numbers<[1], [0], [0], [1], [0, 0, 1, 1], [], []>} : vector<16x128xf32>, vector<128x128xf32>, vector<16x128xf32> -> vector<16x128xf32>
    %5 = vector.extract_strided_slice %4 {offsets = [0, 0], sizes = [8, 128], strides = [1, 1]} : vector<16x128xf32> to vector<8x128xf32>
    %6 = vector.extract_strided_slice %4 {offsets = [8, 0], sizes = [8, 128], strides = [1, 1]} : vector<16x128xf32> to vector<8x128xf32>
    %7 = arith.mulf %5, %5 : vector<8x128xf32>
    %8 = arith.subf %6, %7 : vector<8x128xf32>
    %cst_6 = arith.constant 9.99999974E-6 : f32
    %9 = vector.broadcast %cst_6 : f32 to vector<8x128xf32>
    %10 = arith.addf %8, %9 : vector<8x128xf32>
    %11 = math.rsqrt %10 : vector<8x128xf32>
    %c0_7 = arith.constant 0 : index
    %c0_8 = arith.constant 0 : index
    %c0_9 = arith.constant 0 : index
    %c0_10 = arith.constant 0 : index
    %12 = vector.load %arg1[%c0_7, %c0_8, %c0_9, %c0_10] : memref<1x4x512x8xbf16, #tpu.memory_space<vmem>>, vector<1x1x64x8xbf16>
    %13 = vector.shape_cast %12 : vector<1x1x64x8xbf16> to vector<64x8xbf16>
    %cst_11 = arith.constant dense<0.000000e+00> : vector<64x128xf32>
    %14 = tpu.matmul %13, %0, %cst_11 {dimension_numbers = #tpu.dot_dimension_numbers<[1], [0], [0], [1], [0, 0, 1, 1], [], []>} : vector<64x8xbf16>, vector<8x128xbf16>, vector<64x128xf32> -> vector<64x128xf32>
    %c0_12 = arith.constant 0 : index
    %c1 = arith.constant 1 : index
    %c0_13 = arith.constant 0 : index
    %c0_14 = arith.constant 0 : index
    %15 = vector.load %arg1[%c0_12, %c1, %c0_13, %c0_14] : memref<1x4x512x8xbf16, #tpu.memory_space<vmem>>, vector<1x1x64x8xbf16>
    %16 = vector.shape_cast %15 : vector<1x1x64x8xbf16> to vector<64x8xbf16>
    %cst_15 = arith.constant dense<0.000000e+00> : vector<64x128xf32>
    %17 = tpu.matmul %16, %0, %cst_15 {dimension_numbers = #tpu.dot_dimension_numbers<[1], [0], [0], [1], [0, 0, 1, 1], [], []>} : vector<64x8xbf16>, vector<8x128xbf16>, vector<64x128xf32> -> vector<64x128xf32>
    %18 = arith.maximumf %14, %17 : vector<64x128xf32>
    %c0_16 = arith.constant 0 : index
    %c2 = arith.constant 2 : index
    %c0_17 = arith.constant 0 : index
    %c0_18 = arith.constant 0 : index
    %19 = vector.load %arg1[%c0_16, %c2, %c0_17, %c0_18] : memref<1x4x512x8xbf16, #tpu.memory_space<vmem>>, vector<1x1x64x8xbf16>
    %20 = vector.shape_cast %19 : vector<1x1x64x8xbf16> to vector<64x8xbf16>
    %cst_19 = arith.constant dense<0.000000e+00> : vector<64x128xf32>
    %21 = tpu.matmul %20, %0, %cst_19 {dimension_numbers = #tpu.dot_dimension_numbers<[1], [0], [0], [1], [0, 0, 1, 1], [], []>} : vector<64x8xbf16>, vector<8x128xbf16>, vector<64x128xf32> -> vector<64x128xf32>
    %22 = arith.maximumf %18, %21 : vector<64x128xf32>
    %c0_20 = arith.constant 0 : index
    %c3 = arith.constant 3 : index
    %c0_21 = arith.constant 0 : index
    %c0_22 = arith.constant 0 : index
    %23 = vector.load %arg1[%c0_20, %c3, %c0_21, %c0_22] : memref<1x4x512x8xbf16, #tpu.memory_space<vmem>>, vector<1x1x64x8xbf16>
    %24 = vector.shape_cast %23 : vector<1x1x64x8xbf16> to vector<64x8xbf16>
    %cst_23 = arith.constant dense<0.000000e+00> : vector<64x128xf32>
    %25 = tpu.matmul %24, %0, %cst_23 {dimension_numbers = #tpu.dot_dimension_numbers<[1], [0], [0], [1], [0, 0, 1, 1], [], []>} : vector<64x8xbf16>, vector<8x128xbf16>, vector<64x128xf32> -> vector<64x128xf32>
    %26 = arith.maximumf %22, %25 : vector<64x128xf32>
    %27 = vector.extract_strided_slice %5 {offsets = [0, 0], sizes = [1, 128], strides = [1, 1]} : vector<8x128xf32> to vector<1x128xf32>
    %28 = vector.broadcast %27 : vector<1x128xf32> to vector<64x128xf32>
    %29 = arith.subf %26, %28 : vector<64x128xf32>
    %30 = vector.extract_strided_slice %11 {offsets = [0, 0], sizes = [1, 128], strides = [1, 1]} : vector<8x128xf32> to vector<1x128xf32>
    %31 = vector.broadcast %30 : vector<1x128xf32> to vector<64x128xf32>
    %32 = arith.mulf %29, %31 : vector<64x128xf32>
    %cst_24 = arith.constant 0.000000e+00 : f32
    %33 = vector.broadcast %cst_24 : f32 to vector<64x128xf32>
    %34 = arith.maximumf %32, %33 : vector<64x128xf32>
    %c0_25 = arith.constant 0 : index
    %c0_26 = arith.constant 0 : index
    %c0_27 = arith.constant 0 : index
    %35 = vector.load %arg5[%c0_25, %c0_26, %c0_27] : memref<1x64x128xf32, #tpu.memory_space<vmem>>, vector<1x64x128xf32>
    %36 = vector.shape_cast %35 : vector<1x64x128xf32> to vector<64x128xf32>
    %37 = arith.mulf %34, %36 : vector<64x128xf32>
    %cst_28 = arith.constant dense<0.000000e+00> : vector<128xf32>
    %38 = vector.multi_reduction <add>, %37, %cst_28 [0] : vector<64x128xf32> to vector<128xf32>
    %39 = vector.shape_cast %38 : vector<128xf32> to vector<1x128xf32>
    %c0_29 = arith.constant 0 : index
    %c0_30 = arith.constant 0 : index
    %c64 = arith.constant 64 : index
    %c0_31 = arith.constant 0 : index
    %40 = vector.load %arg1[%c0_29, %c0_30, %c64, %c0_31] : memref<1x4x512x8xbf16, #tpu.memory_space<vmem>>, vector<1x1x64x8xbf16>
    %41 = vector.shape_cast %40 : vector<1x1x64x8xbf16> to vector<64x8xbf16>
    %cst_32 = arith.constant dense<0.000000e+00> : vector<64x128xf32>
    %42 = tpu.matmul %41, %0, %cst_32 {dimension_numbers = #tpu.dot_dimension_numbers<[1], [0], [0], [1], [0, 0, 1, 1], [], []>} : vector<64x8xbf16>, vector<8x128xbf16>, vector<64x128xf32> -> vector<64x128xf32>
    %c0_33 = arith.constant 0 : index
    %c1_34 = arith.constant 1 : index
    %c64_35 = arith.constant 64 : index
    %c0_36 = arith.constant 0 : index
    %43 = vector.load %arg1[%c0_33, %c1_34, %c64_35, %c0_36] : memref<1x4x512x8xbf16, #tpu.memory_space<vmem>>, vector<1x1x64x8xbf16>
    %44 = vector.shape_cast %43 : vector<1x1x64x8xbf16> to vector<64x8xbf16>
    %cst_37 = arith.constant dense<0.000000e+00> : vector<64x128xf32>
    %45 = tpu.matmul %44, %0, %cst_37 {dimension_numbers = #tpu.dot_dimension_numbers<[1], [0], [0], [1], [0, 0, 1, 1], [], []>} : vector<64x8xbf16>, vector<8x128xbf16>, vector<64x128xf32> -> vector<64x128xf32>
    %46 = arith.maximumf %42, %45 : vector<64x128xf32>
    %c0_38 = arith.constant 0 : index
    %c2_39 = arith.constant 2 : index
    %c64_40 = arith.constant 64 : index
    %c0_41 = arith.constant 0 : index
    %47 = vector.load %arg1[%c0_38, %c2_39, %c64_40, %c0_41] : memref<1x4x512x8xbf16, #tpu.memory_space<vmem>>, vector<1x1x64x8xbf16>
    %48 = vector.shape_cast %47 : vector<1x1x64x8xbf16> to vector<64x8xbf16>
    %cst_42 = arith.constant dense<0.000000e+00> : vector<64x128xf32>
    %49 = tpu.matmul %48, %0, %cst_42 {dimension_numbers = #tpu.dot_dimension_numbers<[1], [0], [0], [1], [0, 0, 1, 1], [], []>} : vector<64x8xbf16>, vector<8x128xbf16>, vector<64x128xf32> -> vector<64x128xf32>
    %50 = arith.maximumf %46, %49 : vector<64x128xf32>
    %c0_43 = arith.constant 0 : index
    %c3_44 = arith.constant 3 : index
    %c64_45 = arith.constant 64 : index
    %c0_46 = arith.constant 0 : index
    %51 = vector.load %arg1[%c0_43, %c3_44, %c64_45, %c0_46] : memref<1x4x512x8xbf16, #tpu.memory_space<vmem>>, vector<1x1x64x8xbf16>
    %52 = vector.shape_cast %51 : vector<1x1x64x8xbf16> to vector<64x8xbf16>
    %cst_47 = arith.constant dense<0.000000e+00> : vector<64x128xf32>
    %53 = tpu.matmul %52, %0, %cst_47 {dimension_numbers = #tpu.dot_dimension_numbers<[1], [0], [0], [1], [0, 0, 1, 1], [], []>} : vector<64x8xbf16>, vector<8x128xbf16>, vector<64x128xf32> -> vector<64x128xf32>
    %54 = arith.maximumf %50, %53 : vector<64x128xf32>
    %55 = vector.extract_strided_slice %5 {offsets = [1, 0], sizes = [1, 128], strides = [1, 1]} : vector<8x128xf32> to vector<1x128xf32>
    %56 = vector.broadcast %55 : vector<1x128xf32> to vector<64x128xf32>
    %57 = arith.subf %54, %56 : vector<64x128xf32>
    %58 = vector.extract_strided_slice %11 {offsets = [1, 0], sizes = [1, 128], strides = [1, 1]} : vector<8x128xf32> to vector<1x128xf32>
    %59 = vector.broadcast %58 : vector<1x128xf32> to vector<64x128xf32>
    %60 = arith.mulf %57, %59 : vector<64x128xf32>
    %cst_48 = arith.constant 0.000000e+00 : f32
    %61 = vector.broadcast %cst_48 : f32 to vector<64x128xf32>
    %62 = arith.maximumf %60, %61 : vector<64x128xf32>
    %c0_49 = arith.constant 0 : index
    %c0_50 = arith.constant 0 : index
    %c0_51 = arith.constant 0 : index
    %63 = vector.load %arg5[%c0_49, %c0_50, %c0_51] : memref<1x64x128xf32, #tpu.memory_space<vmem>>, vector<1x64x128xf32>
    %64 = vector.shape_cast %63 : vector<1x64x128xf32> to vector<64x128xf32>
    %65 = arith.mulf %62, %64 : vector<64x128xf32>
    %cst_52 = arith.constant dense<0.000000e+00> : vector<128xf32>
    %66 = vector.multi_reduction <add>, %65, %cst_52 [0] : vector<64x128xf32> to vector<128xf32>
    %67 = vector.shape_cast %66 : vector<128xf32> to vector<1x128xf32>
    %c0_53 = arith.constant 0 : index
    %c0_54 = arith.constant 0 : index
    %c128 = arith.constant 128 : index
    %c0_55 = arith.constant 0 : index
    %68 = vector.load %arg1[%c0_53, %c0_54, %c128, %c0_55] : memref<1x4x512x8xbf16, #tpu.memory_space<vmem>>, vector<1x1x64x8xbf16>
    %69 = vector.shape_cast %68 : vector<1x1x64x8xbf16> to vector<64x8xbf16>
    %cst_56 = arith.constant dense<0.000000e+00> : vector<64x128xf32>
    %70 = tpu.matmul %69, %0, %cst_56 {dimension_numbers = #tpu.dot_dimension_numbers<[1], [0], [0], [1], [0, 0, 1, 1], [], []>} : vector<64x8xbf16>, vector<8x128xbf16>, vector<64x128xf32> -> vector<64x128xf32>
    %c0_57 = arith.constant 0 : index
    %c1_58 = arith.constant 1 : index
    %c128_59 = arith.constant 128 : index
    %c0_60 = arith.constant 0 : index
    %71 = vector.load %arg1[%c0_57, %c1_58, %c128_59, %c0_60] : memref<1x4x512x8xbf16, #tpu.memory_space<vmem>>, vector<1x1x64x8xbf16>
    %72 = vector.shape_cast %71 : vector<1x1x64x8xbf16> to vector<64x8xbf16>
    %cst_61 = arith.constant dense<0.000000e+00> : vector<64x128xf32>
    %73 = tpu.matmul %72, %0, %cst_61 {dimension_numbers = #tpu.dot_dimension_numbers<[1], [0], [0], [1], [0, 0, 1, 1], [], []>} : vector<64x8xbf16>, vector<8x128xbf16>, vector<64x128xf32> -> vector<64x128xf32>
    %74 = arith.maximumf %70, %73 : vector<64x128xf32>
    %c0_62 = arith.constant 0 : index
    %c2_63 = arith.constant 2 : index
    %c128_64 = arith.constant 128 : index
    %c0_65 = arith.constant 0 : index
    %75 = vector.load %arg1[%c0_62, %c2_63, %c128_64, %c0_65] : memref<1x4x512x8xbf16, #tpu.memory_space<vmem>>, vector<1x1x64x8xbf16>
    %76 = vector.shape_cast %75 : vector<1x1x64x8xbf16> to vector<64x8xbf16>
    %cst_66 = arith.constant dense<0.000000e+00> : vector<64x128xf32>
    %77 = tpu.matmul %76, %0, %cst_66 {dimension_numbers = #tpu.dot_dimension_numbers<[1], [0], [0], [1], [0, 0, 1, 1], [], []>} : vector<64x8xbf16>, vector<8x128xbf16>, vector<64x128xf32> -> vector<64x128xf32>
    %78 = arith.maximumf %74, %77 : vector<64x128xf32>
    %c0_67 = arith.constant 0 : index
    %c3_68 = arith.constant 3 : index
    %c128_69 = arith.constant 128 : index
    %c0_70 = arith.constant 0 : index
    %79 = vector.load %arg1[%c0_67, %c3_68, %c128_69, %c0_70] : memref<1x4x512x8xbf16, #tpu.memory_space<vmem>>, vector<1x1x64x8xbf16>
    %80 = vector.shape_cast %79 : vector<1x1x64x8xbf16> to vector<64x8xbf16>
    %cst_71 = arith.constant dense<0.000000e+00> : vector<64x128xf32>
    %81 = tpu.matmul %80, %0, %cst_71 {dimension_numbers = #tpu.dot_dimension_numbers<[1], [0], [0], [1], [0, 0, 1, 1], [], []>} : vector<64x8xbf16>, vector<8x128xbf16>, vector<64x128xf32> -> vector<64x128xf32>
    %82 = arith.maximumf %78, %81 : vector<64x128xf32>
    %83 = vector.extract_strided_slice %5 {offsets = [2, 0], sizes = [1, 128], strides = [1, 1]} : vector<8x128xf32> to vector<1x128xf32>
    %84 = vector.broadcast %83 : vector<1x128xf32> to vector<64x128xf32>
    %85 = arith.subf %82, %84 : vector<64x128xf32>
    %86 = vector.extract_strided_slice %11 {offsets = [2, 0], sizes = [1, 128], strides = [1, 1]} : vector<8x128xf32> to vector<1x128xf32>
    %87 = vector.broadcast %86 : vector<1x128xf32> to vector<64x128xf32>
    %88 = arith.mulf %85, %87 : vector<64x128xf32>
    %cst_72 = arith.constant 0.000000e+00 : f32
    %89 = vector.broadcast %cst_72 : f32 to vector<64x128xf32>
    %90 = arith.maximumf %88, %89 : vector<64x128xf32>
    %c0_73 = arith.constant 0 : index
    %c0_74 = arith.constant 0 : index
    %c0_75 = arith.constant 0 : index
    %91 = vector.load %arg5[%c0_73, %c0_74, %c0_75] : memref<1x64x128xf32, #tpu.memory_space<vmem>>, vector<1x64x128xf32>
    %92 = vector.shape_cast %91 : vector<1x64x128xf32> to vector<64x128xf32>
    %93 = arith.mulf %90, %92 : vector<64x128xf32>
    %cst_76 = arith.constant dense<0.000000e+00> : vector<128xf32>
    %94 = vector.multi_reduction <add>, %93, %cst_76 [0] : vector<64x128xf32> to vector<128xf32>
    %95 = vector.shape_cast %94 : vector<128xf32> to vector<1x128xf32>
    %c0_77 = arith.constant 0 : index
    %c0_78 = arith.constant 0 : index
    %c192 = arith.constant 192 : index
    %c0_79 = arith.constant 0 : index
    %96 = vector.load %arg1[%c0_77, %c0_78, %c192, %c0_79] : memref<1x4x512x8xbf16, #tpu.memory_space<vmem>>, vector<1x1x64x8xbf16>
    %97 = vector.shape_cast %96 : vector<1x1x64x8xbf16> to vector<64x8xbf16>
    %cst_80 = arith.constant dense<0.000000e+00> : vector<64x128xf32>
    %98 = tpu.matmul %97, %0, %cst_80 {dimension_numbers = #tpu.dot_dimension_numbers<[1], [0], [0], [1], [0, 0, 1, 1], [], []>} : vector<64x8xbf16>, vector<8x128xbf16>, vector<64x128xf32> -> vector<64x128xf32>
    %c0_81 = arith.constant 0 : index
    %c1_82 = arith.constant 1 : index
    %c192_83 = arith.constant 192 : index
    %c0_84 = arith.constant 0 : index
    %99 = vector.load %arg1[%c0_81, %c1_82, %c192_83, %c0_84] : memref<1x4x512x8xbf16, #tpu.memory_space<vmem>>, vector<1x1x64x8xbf16>
    %100 = vector.shape_cast %99 : vector<1x1x64x8xbf16> to vector<64x8xbf16>
    %cst_85 = arith.constant dense<0.000000e+00> : vector<64x128xf32>
    %101 = tpu.matmul %100, %0, %cst_85 {dimension_numbers = #tpu.dot_dimension_numbers<[1], [0], [0], [1], [0, 0, 1, 1], [], []>} : vector<64x8xbf16>, vector<8x128xbf16>, vector<64x128xf32> -> vector<64x128xf32>
    %102 = arith.maximumf %98, %101 : vector<64x128xf32>
    %c0_86 = arith.constant 0 : index
    %c2_87 = arith.constant 2 : index
    %c192_88 = arith.constant 192 : index
    %c0_89 = arith.constant 0 : index
    %103 = vector.load %arg1[%c0_86, %c2_87, %c192_88, %c0_89] : memref<1x4x512x8xbf16, #tpu.memory_space<vmem>>, vector<1x1x64x8xbf16>
    %104 = vector.shape_cast %103 : vector<1x1x64x8xbf16> to vector<64x8xbf16>
    %cst_90 = arith.constant dense<0.000000e+00> : vector<64x128xf32>
    %105 = tpu.matmul %104, %0, %cst_90 {dimension_numbers = #tpu.dot_dimension_numbers<[1], [0], [0], [1], [0, 0, 1, 1], [], []>} : vector<64x8xbf16>, vector<8x128xbf16>, vector<64x128xf32> -> vector<64x128xf32>
    %106 = arith.maximumf %102, %105 : vector<64x128xf32>
    %c0_91 = arith.constant 0 : index
    %c3_92 = arith.constant 3 : index
    %c192_93 = arith.constant 192 : index
    %c0_94 = arith.constant 0 : index
    %107 = vector.load %arg1[%c0_91, %c3_92, %c192_93, %c0_94] : memref<1x4x512x8xbf16, #tpu.memory_space<vmem>>, vector<1x1x64x8xbf16>
    %108 = vector.shape_cast %107 : vector<1x1x64x8xbf16> to vector<64x8xbf16>
    %cst_95 = arith.constant dense<0.000000e+00> : vector<64x128xf32>
    %109 = tpu.matmul %108, %0, %cst_95 {dimension_numbers = #tpu.dot_dimension_numbers<[1], [0], [0], [1], [0, 0, 1, 1], [], []>} : vector<64x8xbf16>, vector<8x128xbf16>, vector<64x128xf32> -> vector<64x128xf32>
    %110 = arith.maximumf %106, %109 : vector<64x128xf32>
    %111 = vector.extract_strided_slice %5 {offsets = [3, 0], sizes = [1, 128], strides = [1, 1]} : vector<8x128xf32> to vector<1x128xf32>
    %112 = vector.broadcast %111 : vector<1x128xf32> to vector<64x128xf32>
    %113 = arith.subf %110, %112 : vector<64x128xf32>
    %114 = vector.extract_strided_slice %11 {offsets = [3, 0], sizes = [1, 128], strides = [1, 1]} : vector<8x128xf32> to vector<1x128xf32>
    %115 = vector.broadcast %114 : vector<1x128xf32> to vector<64x128xf32>
    %116 = arith.mulf %113, %115 : vector<64x128xf32>
    %cst_96 = arith.constant 0.000000e+00 : f32
    %117 = vector.broadcast %cst_96 : f32 to vector<64x128xf32>
    %118 = arith.maximumf %116, %117 : vector<64x128xf32>
    %c0_97 = arith.constant 0 : index
    %c0_98 = arith.constant 0 : index
    %c0_99 = arith.constant 0 : index
    %119 = vector.load %arg5[%c0_97, %c0_98, %c0_99] : memref<1x64x128xf32, #tpu.memory_space<vmem>>, vector<1x64x128xf32>
    %120 = vector.shape_cast %119 : vector<1x64x128xf32> to vector<64x128xf32>
    %121 = arith.mulf %118, %120 : vector<64x128xf32>
    %cst_100 = arith.constant dense<0.000000e+00> : vector<128xf32>
    %122 = vector.multi_reduction <add>, %121, %cst_100 [0] : vector<64x128xf32> to vector<128xf32>
    %123 = vector.shape_cast %122 : vector<128xf32> to vector<1x128xf32>
    %c0_101 = arith.constant 0 : index
    %c0_102 = arith.constant 0 : index
    %c256 = arith.constant 256 : index
    %c0_103 = arith.constant 0 : index
    %124 = vector.load %arg1[%c0_101, %c0_102, %c256, %c0_103] : memref<1x4x512x8xbf16, #tpu.memory_space<vmem>>, vector<1x1x64x8xbf16>
    %125 = vector.shape_cast %124 : vector<1x1x64x8xbf16> to vector<64x8xbf16>
    %cst_104 = arith.constant dense<0.000000e+00> : vector<64x128xf32>
    %126 = tpu.matmul %125, %0, %cst_104 {dimension_numbers = #tpu.dot_dimension_numbers<[1], [0], [0], [1], [0, 0, 1, 1], [], []>} : vector<64x8xbf16>, vector<8x128xbf16>, vector<64x128xf32> -> vector<64x128xf32>
    %c0_105 = arith.constant 0 : index
    %c1_106 = arith.constant 1 : index
    %c256_107 = arith.constant 256 : index
    %c0_108 = arith.constant 0 : index
    %127 = vector.load %arg1[%c0_105, %c1_106, %c256_107, %c0_108] : memref<1x4x512x8xbf16, #tpu.memory_space<vmem>>, vector<1x1x64x8xbf16>
    %128 = vector.shape_cast %127 : vector<1x1x64x8xbf16> to vector<64x8xbf16>
    %cst_109 = arith.constant dense<0.000000e+00> : vector<64x128xf32>
    %129 = tpu.matmul %128, %0, %cst_109 {dimension_numbers = #tpu.dot_dimension_numbers<[1], [0], [0], [1], [0, 0, 1, 1], [], []>} : vector<64x8xbf16>, vector<8x128xbf16>, vector<64x128xf32> -> vector<64x128xf32>
    %130 = arith.maximumf %126, %129 : vector<64x128xf32>
    %c0_110 = arith.constant 0 : index
    %c2_111 = arith.constant 2 : index
    %c256_112 = arith.constant 256 : index
    %c0_113 = arith.constant 0 : index
    %131 = vector.load %arg1[%c0_110, %c2_111, %c256_112, %c0_113] : memref<1x4x512x8xbf16, #tpu.memory_space<vmem>>, vector<1x1x64x8xbf16>
    %132 = vector.shape_cast %131 : vector<1x1x64x8xbf16> to vector<64x8xbf16>
    %cst_114 = arith.constant dense<0.000000e+00> : vector<64x128xf32>
    %133 = tpu.matmul %132, %0, %cst_114 {dimension_numbers = #tpu.dot_dimension_numbers<[1], [0], [0], [1], [0, 0, 1, 1], [], []>} : vector<64x8xbf16>, vector<8x128xbf16>, vector<64x128xf32> -> vector<64x128xf32>
    %134 = arith.maximumf %130, %133 : vector<64x128xf32>
    %c0_115 = arith.constant 0 : index
    %c3_116 = arith.constant 3 : index
    %c256_117 = arith.constant 256 : index
    %c0_118 = arith.constant 0 : index
    %135 = vector.load %arg1[%c0_115, %c3_116, %c256_117, %c0_118] : memref<1x4x512x8xbf16, #tpu.memory_space<vmem>>, vector<1x1x64x8xbf16>
    %136 = vector.shape_cast %135 : vector<1x1x64x8xbf16> to vector<64x8xbf16>
    %cst_119 = arith.constant dense<0.000000e+00> : vector<64x128xf32>
    %137 = tpu.matmul %136, %0, %cst_119 {dimension_numbers = #tpu.dot_dimension_numbers<[1], [0], [0], [1], [0, 0, 1, 1], [], []>} : vector<64x8xbf16>, vector<8x128xbf16>, vector<64x128xf32> -> vector<64x128xf32>
    %138 = arith.maximumf %134, %137 : vector<64x128xf32>
    %139 = vector.extract_strided_slice %5 {offsets = [4, 0], sizes = [1, 128], strides = [1, 1]} : vector<8x128xf32> to vector<1x128xf32>
    %140 = vector.broadcast %139 : vector<1x128xf32> to vector<64x128xf32>
    %141 = arith.subf %138, %140 : vector<64x128xf32>
    %142 = vector.extract_strided_slice %11 {offsets = [4, 0], sizes = [1, 128], strides = [1, 1]} : vector<8x128xf32> to vector<1x128xf32>
    %143 = vector.broadcast %142 : vector<1x128xf32> to vector<64x128xf32>
    %144 = arith.mulf %141, %143 : vector<64x128xf32>
    %cst_120 = arith.constant 0.000000e+00 : f32
    %145 = vector.broadcast %cst_120 : f32 to vector<64x128xf32>
    %146 = arith.maximumf %144, %145 : vector<64x128xf32>
    %c0_121 = arith.constant 0 : index
    %c0_122 = arith.constant 0 : index
    %c0_123 = arith.constant 0 : index
    %147 = vector.load %arg5[%c0_121, %c0_122, %c0_123] : memref<1x64x128xf32, #tpu.memory_space<vmem>>, vector<1x64x128xf32>
    %148 = vector.shape_cast %147 : vector<1x64x128xf32> to vector<64x128xf32>
    %149 = arith.mulf %146, %148 : vector<64x128xf32>
    %cst_124 = arith.constant dense<0.000000e+00> : vector<128xf32>
    %150 = vector.multi_reduction <add>, %149, %cst_124 [0] : vector<64x128xf32> to vector<128xf32>
    %151 = vector.shape_cast %150 : vector<128xf32> to vector<1x128xf32>
    %c0_125 = arith.constant 0 : index
    %c0_126 = arith.constant 0 : index
    %c320 = arith.constant 320 : index
    %c0_127 = arith.constant 0 : index
    %152 = vector.load %arg1[%c0_125, %c0_126, %c320, %c0_127] : memref<1x4x512x8xbf16, #tpu.memory_space<vmem>>, vector<1x1x64x8xbf16>
    %153 = vector.shape_cast %152 : vector<1x1x64x8xbf16> to vector<64x8xbf16>
    %cst_128 = arith.constant dense<0.000000e+00> : vector<64x128xf32>
    %154 = tpu.matmul %153, %0, %cst_128 {dimension_numbers = #tpu.dot_dimension_numbers<[1], [0], [0], [1], [0, 0, 1, 1], [], []>} : vector<64x8xbf16>, vector<8x128xbf16>, vector<64x128xf32> -> vector<64x128xf32>
    %c0_129 = arith.constant 0 : index
    %c1_130 = arith.constant 1 : index
    %c320_131 = arith.constant 320 : index
    %c0_132 = arith.constant 0 : index
    %155 = vector.load %arg1[%c0_129, %c1_130, %c320_131, %c0_132] : memref<1x4x512x8xbf16, #tpu.memory_space<vmem>>, vector<1x1x64x8xbf16>
    %156 = vector.shape_cast %155 : vector<1x1x64x8xbf16> to vector<64x8xbf16>
    %cst_133 = arith.constant dense<0.000000e+00> : vector<64x128xf32>
    %157 = tpu.matmul %156, %0, %cst_133 {dimension_numbers = #tpu.dot_dimension_numbers<[1], [0], [0], [1], [0, 0, 1, 1], [], []>} : vector<64x8xbf16>, vector<8x128xbf16>, vector<64x128xf32> -> vector<64x128xf32>
    %158 = arith.maximumf %154, %157 : vector<64x128xf32>
    %c0_134 = arith.constant 0 : index
    %c2_135 = arith.constant 2 : index
    %c320_136 = arith.constant 320 : index
    %c0_137 = arith.constant 0 : index
    %159 = vector.load %arg1[%c0_134, %c2_135, %c320_136, %c0_137] : memref<1x4x512x8xbf16, #tpu.memory_space<vmem>>, vector<1x1x64x8xbf16>
    %160 = vector.shape_cast %159 : vector<1x1x64x8xbf16> to vector<64x8xbf16>
    %cst_138 = arith.constant dense<0.000000e+00> : vector<64x128xf32>
    %161 = tpu.matmul %160, %0, %cst_138 {dimension_numbers = #tpu.dot_dimension_numbers<[1], [0], [0], [1], [0, 0, 1, 1], [], []>} : vector<64x8xbf16>, vector<8x128xbf16>, vector<64x128xf32> -> vector<64x128xf32>
    %162 = arith.maximumf %158, %161 : vector<64x128xf32>
    %c0_139 = arith.constant 0 : index
    %c3_140 = arith.constant 3 : index
    %c320_141 = arith.constant 320 : index
    %c0_142 = arith.constant 0 : index
    %163 = vector.load %arg1[%c0_139, %c3_140, %c320_141, %c0_142] : memref<1x4x512x8xbf16, #tpu.memory_space<vmem>>, vector<1x1x64x8xbf16>
    %164 = vector.shape_cast %163 : vector<1x1x64x8xbf16> to vector<64x8xbf16>
    %cst_143 = arith.constant dense<0.000000e+00> : vector<64x128xf32>
    %165 = tpu.matmul %164, %0, %cst_143 {dimension_numbers = #tpu.dot_dimension_numbers<[1], [0], [0], [1], [0, 0, 1, 1], [], []>} : vector<64x8xbf16>, vector<8x128xbf16>, vector<64x128xf32> -> vector<64x128xf32>
    %166 = arith.maximumf %162, %165 : vector<64x128xf32>
    %167 = vector.extract_strided_slice %5 {offsets = [5, 0], sizes = [1, 128], strides = [1, 1]} : vector<8x128xf32> to vector<1x128xf32>
    %168 = vector.broadcast %167 : vector<1x128xf32> to vector<64x128xf32>
    %169 = arith.subf %166, %168 : vector<64x128xf32>
    %170 = vector.extract_strided_slice %11 {offsets = [5, 0], sizes = [1, 128], strides = [1, 1]} : vector<8x128xf32> to vector<1x128xf32>
    %171 = vector.broadcast %170 : vector<1x128xf32> to vector<64x128xf32>
    %172 = arith.mulf %169, %171 : vector<64x128xf32>
    %cst_144 = arith.constant 0.000000e+00 : f32
    %173 = vector.broadcast %cst_144 : f32 to vector<64x128xf32>
    %174 = arith.maximumf %172, %173 : vector<64x128xf32>
    %c0_145 = arith.constant 0 : index
    %c0_146 = arith.constant 0 : index
    %c0_147 = arith.constant 0 : index
    %175 = vector.load %arg5[%c0_145, %c0_146, %c0_147] : memref<1x64x128xf32, #tpu.memory_space<vmem>>, vector<1x64x128xf32>
    %176 = vector.shape_cast %175 : vector<1x64x128xf32> to vector<64x128xf32>
    %177 = arith.mulf %174, %176 : vector<64x128xf32>
    %cst_148 = arith.constant dense<0.000000e+00> : vector<128xf32>
    %178 = vector.multi_reduction <add>, %177, %cst_148 [0] : vector<64x128xf32> to vector<128xf32>
    %179 = vector.shape_cast %178 : vector<128xf32> to vector<1x128xf32>
    %c0_149 = arith.constant 0 : index
    %c0_150 = arith.constant 0 : index
    %c384 = arith.constant 384 : index
    %c0_151 = arith.constant 0 : index
    %180 = vector.load %arg1[%c0_149, %c0_150, %c384, %c0_151] : memref<1x4x512x8xbf16, #tpu.memory_space<vmem>>, vector<1x1x64x8xbf16>
    %181 = vector.shape_cast %180 : vector<1x1x64x8xbf16> to vector<64x8xbf16>
    %cst_152 = arith.constant dense<0.000000e+00> : vector<64x128xf32>
    %182 = tpu.matmul %181, %0, %cst_152 {dimension_numbers = #tpu.dot_dimension_numbers<[1], [0], [0], [1], [0, 0, 1, 1], [], []>} : vector<64x8xbf16>, vector<8x128xbf16>, vector<64x128xf32> -> vector<64x128xf32>
    %c0_153 = arith.constant 0 : index
    %c1_154 = arith.constant 1 : index
    %c384_155 = arith.constant 384 : index
    %c0_156 = arith.constant 0 : index
    %183 = vector.load %arg1[%c0_153, %c1_154, %c384_155, %c0_156] : memref<1x4x512x8xbf16, #tpu.memory_space<vmem>>, vector<1x1x64x8xbf16>
    %184 = vector.shape_cast %183 : vector<1x1x64x8xbf16> to vector<64x8xbf16>
    %cst_157 = arith.constant dense<0.000000e+00> : vector<64x128xf32>
    %185 = tpu.matmul %184, %0, %cst_157 {dimension_numbers = #tpu.dot_dimension_numbers<[1], [0], [0], [1], [0, 0, 1, 1], [], []>} : vector<64x8xbf16>, vector<8x128xbf16>, vector<64x128xf32> -> vector<64x128xf32>
    %186 = arith.maximumf %182, %185 : vector<64x128xf32>
    %c0_158 = arith.constant 0 : index
    %c2_159 = arith.constant 2 : index
    %c384_160 = arith.constant 384 : index
    %c0_161 = arith.constant 0 : index
    %187 = vector.load %arg1[%c0_158, %c2_159, %c384_160, %c0_161] : memref<1x4x512x8xbf16, #tpu.memory_space<vmem>>, vector<1x1x64x8xbf16>
    %188 = vector.shape_cast %187 : vector<1x1x64x8xbf16> to vector<64x8xbf16>
    %cst_162 = arith.constant dense<0.000000e+00> : vector<64x128xf32>
    %189 = tpu.matmul %188, %0, %cst_162 {dimension_numbers = #tpu.dot_dimension_numbers<[1], [0], [0], [1], [0, 0, 1, 1], [], []>} : vector<64x8xbf16>, vector<8x128xbf16>, vector<64x128xf32> -> vector<64x128xf32>
    %190 = arith.maximumf %186, %189 : vector<64x128xf32>
    %c0_163 = arith.constant 0 : index
    %c3_164 = arith.constant 3 : index
    %c384_165 = arith.constant 384 : index
    %c0_166 = arith.constant 0 : index
    %191 = vector.load %arg1[%c0_163, %c3_164, %c384_165, %c0_166] : memref<1x4x512x8xbf16, #tpu.memory_space<vmem>>, vector<1x1x64x8xbf16>
    %192 = vector.shape_cast %191 : vector<1x1x64x8xbf16> to vector<64x8xbf16>
    %cst_167 = arith.constant dense<0.000000e+00> : vector<64x128xf32>
    %193 = tpu.matmul %192, %0, %cst_167 {dimension_numbers = #tpu.dot_dimension_numbers<[1], [0], [0], [1], [0, 0, 1, 1], [], []>} : vector<64x8xbf16>, vector<8x128xbf16>, vector<64x128xf32> -> vector<64x128xf32>
    %194 = arith.maximumf %190, %193 : vector<64x128xf32>
    %195 = vector.extract_strided_slice %5 {offsets = [6, 0], sizes = [1, 128], strides = [1, 1]} : vector<8x128xf32> to vector<1x128xf32>
    %196 = vector.broadcast %195 : vector<1x128xf32> to vector<64x128xf32>
    %197 = arith.subf %194, %196 : vector<64x128xf32>
    %198 = vector.extract_strided_slice %11 {offsets = [6, 0], sizes = [1, 128], strides = [1, 1]} : vector<8x128xf32> to vector<1x128xf32>
    %199 = vector.broadcast %198 : vector<1x128xf32> to vector<64x128xf32>
    %200 = arith.mulf %197, %199 : vector<64x128xf32>
    %cst_168 = arith.constant 0.000000e+00 : f32
    %201 = vector.broadcast %cst_168 : f32 to vector<64x128xf32>
    %202 = arith.maximumf %200, %201 : vector<64x128xf32>
    %c0_169 = arith.constant 0 : index
    %c0_170 = arith.constant 0 : index
    %c0_171 = arith.constant 0 : index
    %203 = vector.load %arg5[%c0_169, %c0_170, %c0_171] : memref<1x64x128xf32, #tpu.memory_space<vmem>>, vector<1x64x128xf32>
    %204 = vector.shape_cast %203 : vector<1x64x128xf32> to vector<64x128xf32>
    %205 = arith.mulf %202, %204 : vector<64x128xf32>
    %cst_172 = arith.constant dense<0.000000e+00> : vector<128xf32>
    %206 = vector.multi_reduction <add>, %205, %cst_172 [0] : vector<64x128xf32> to vector<128xf32>
    %207 = vector.shape_cast %206 : vector<128xf32> to vector<1x128xf32>
    %c0_173 = arith.constant 0 : index
    %c0_174 = arith.constant 0 : index
    %c448 = arith.constant 448 : index
    %c0_175 = arith.constant 0 : index
    %208 = vector.load %arg1[%c0_173, %c0_174, %c448, %c0_175] : memref<1x4x512x8xbf16, #tpu.memory_space<vmem>>, vector<1x1x64x8xbf16>
    %209 = vector.shape_cast %208 : vector<1x1x64x8xbf16> to vector<64x8xbf16>
    %cst_176 = arith.constant dense<0.000000e+00> : vector<64x128xf32>
    %210 = tpu.matmul %209, %0, %cst_176 {dimension_numbers = #tpu.dot_dimension_numbers<[1], [0], [0], [1], [0, 0, 1, 1], [], []>} : vector<64x8xbf16>, vector<8x128xbf16>, vector<64x128xf32> -> vector<64x128xf32>
    %c0_177 = arith.constant 0 : index
    %c1_178 = arith.constant 1 : index
    %c448_179 = arith.constant 448 : index
    %c0_180 = arith.constant 0 : index
    %211 = vector.load %arg1[%c0_177, %c1_178, %c448_179, %c0_180] : memref<1x4x512x8xbf16, #tpu.memory_space<vmem>>, vector<1x1x64x8xbf16>
    %212 = vector.shape_cast %211 : vector<1x1x64x8xbf16> to vector<64x8xbf16>
    %cst_181 = arith.constant dense<0.000000e+00> : vector<64x128xf32>
    %213 = tpu.matmul %212, %0, %cst_181 {dimension_numbers = #tpu.dot_dimension_numbers<[1], [0], [0], [1], [0, 0, 1, 1], [], []>} : vector<64x8xbf16>, vector<8x128xbf16>, vector<64x128xf32> -> vector<64x128xf32>
    %214 = arith.maximumf %210, %213 : vector<64x128xf32>
    %c0_182 = arith.constant 0 : index
    %c2_183 = arith.constant 2 : index
    %c448_184 = arith.constant 448 : index
    %c0_185 = arith.constant 0 : index
    %215 = vector.load %arg1[%c0_182, %c2_183, %c448_184, %c0_185] : memref<1x4x512x8xbf16, #tpu.memory_space<vmem>>, vector<1x1x64x8xbf16>
    %216 = vector.shape_cast %215 : vector<1x1x64x8xbf16> to vector<64x8xbf16>
    %cst_186 = arith.constant dense<0.000000e+00> : vector<64x128xf32>
    %217 = tpu.matmul %216, %0, %cst_186 {dimension_numbers = #tpu.dot_dimension_numbers<[1], [0], [0], [1], [0, 0, 1, 1], [], []>} : vector<64x8xbf16>, vector<8x128xbf16>, vector<64x128xf32> -> vector<64x128xf32>
    %218 = arith.maximumf %214, %217 : vector<64x128xf32>
    %c0_187 = arith.constant 0 : index
    %c3_188 = arith.constant 3 : index
    %c448_189 = arith.constant 448 : index
    %c0_190 = arith.constant 0 : index
    %219 = vector.load %arg1[%c0_187, %c3_188, %c448_189, %c0_190] : memref<1x4x512x8xbf16, #tpu.memory_space<vmem>>, vector<1x1x64x8xbf16>
    %220 = vector.shape_cast %219 : vector<1x1x64x8xbf16> to vector<64x8xbf16>
    %cst_191 = arith.constant dense<0.000000e+00> : vector<64x128xf32>
    %221 = tpu.matmul %220, %0, %cst_191 {dimension_numbers = #tpu.dot_dimension_numbers<[1], [0], [0], [1], [0, 0, 1, 1], [], []>} : vector<64x8xbf16>, vector<8x128xbf16>, vector<64x128xf32> -> vector<64x128xf32>
    %222 = arith.maximumf %218, %221 : vector<64x128xf32>
    %223 = vector.extract_strided_slice %5 {offsets = [7, 0], sizes = [1, 128], strides = [1, 1]} : vector<8x128xf32> to vector<1x128xf32>
    %224 = vector.broadcast %223 : vector<1x128xf32> to vector<64x128xf32>
    %225 = arith.subf %222, %224 : vector<64x128xf32>
    %226 = vector.extract_strided_slice %11 {offsets = [7, 0], sizes = [1, 128], strides = [1, 1]} : vector<8x128xf32> to vector<1x128xf32>
    %227 = vector.broadcast %226 : vector<1x128xf32> to vector<64x128xf32>
    %228 = arith.mulf %225, %227 : vector<64x128xf32>
    %cst_192 = arith.constant 0.000000e+00 : f32
    %229 = vector.broadcast %cst_192 : f32 to vector<64x128xf32>
    %230 = arith.maximumf %228, %229 : vector<64x128xf32>
    %c0_193 = arith.constant 0 : index
    %c0_194 = arith.constant 0 : index
    %c0_195 = arith.constant 0 : index
    %231 = vector.load %arg5[%c0_193, %c0_194, %c0_195] : memref<1x64x128xf32, #tpu.memory_space<vmem>>, vector<1x64x128xf32>
    %232 = vector.shape_cast %231 : vector<1x64x128xf32> to vector<64x128xf32>
    %233 = arith.mulf %230, %232 : vector<64x128xf32>
    %cst_196 = arith.constant dense<0.000000e+00> : vector<128xf32>
    %234 = vector.multi_reduction <add>, %233, %cst_196 [0] : vector<64x128xf32> to vector<128xf32>
    %235 = vector.shape_cast %234 : vector<128xf32> to vector<1x128xf32>
    %236 = tpu.concatenate %39, %67, %95, %123, %151, %179, %207, %235 in 0 : vector<1x128xf32>, vector<1x128xf32>, vector<1x128xf32>, vector<1x128xf32>, vector<1x128xf32>, vector<1x128xf32>, vector<1x128xf32>, vector<1x128xf32> -> vector<8x128xf32>
    %c0_197 = arith.constant 0 : index
    %c0_198 = arith.constant 0 : index
    %237 = vector.load %arg6[%c0_197, %c0_198] : memref<128x128xf32, #tpu.memory_space<vmem>>, vector<128x128xf32>
    %cst_199 = arith.constant dense<0.000000e+00> : vector<8x128xf32>
    %238 = tpu.matmul %236, %237, %cst_199 {dimension_numbers = #tpu.dot_dimension_numbers<[1], [0], [0], [1], [0, 0, 1, 1], [], []>} : vector<8x128xf32>, vector<128x128xf32>, vector<8x128xf32> -> vector<8x128xf32>
    %c0_200 = arith.constant 0 : index
    %c0_201 = arith.constant 0 : index
    %239 = vector.load %arg7[%c0_200, %c0_201] : memref<8x128xf32, #tpu.memory_space<vmem>>, vector<8x128xf32>
    %240 = arith.addf %238, %239 : vector<8x128xf32>
    %c0_202 = arith.constant 0 : index
    %c0_203 = arith.constant 0 : index
    %c0_204 = arith.constant 0 : index
    %241 = vector.load %arg8[%c0_202, %c0_203, %c0_204] : memref<1x8x128xf32, #tpu.memory_space<vmem>>, vector<1x8x128xf32>
    %242 = vector.shape_cast %241 : vector<1x8x128xf32> to vector<8x128xf32>
    %243 = vector.shape_cast %240 : vector<8x128xf32> to vector<1x8x128xf32>
    tpu.vector_store %arg8[%c0_202, %c0_203, %c0_204], %243 {strides = array<i32>} : memref<1x8x128xf32, #tpu.memory_space<vmem>>, vector<1x8x128xf32>,
    return
  }
  func.func @transform_0(%arg0: i32) -> (i32, i32, i32, i32) {
    %c0_i32 = arith.constant 0 : i32
    %c0_i32_0 = arith.constant 0 : i32
    %c0_i32_1 = arith.constant 0 : i32
    %c0_i32_2 = arith.constant 0 : i32
    return %arg0, %c0_i32, %c0_i32_0, %c0_i32_1 : i32, i32, i32, i32
  }
  func.func @transform_1(%arg0: i32) -> (i32, i32, i32) {
    %c0_i32 = arith.constant 0 : i32
    %c0_i32_0 = arith.constant 0 : i32
    %c0_i32_1 = arith.constant 0 : i32
    return %arg0, %c0_i32, %c0_i32_0 : i32, i32, i32
  }
  func.func @transform_2(%arg0: i32) -> (i32, i32) {
    %c0_i32 = arith.constant 0 : i32
    %c0_i32_0 = arith.constant 0 : i32
    %c0_i32_1 = arith.constant 0 : i32
    return %c0_i32, %c0_i32_0 : i32, i32
  }
  func.func @transform_3(%arg0: i32) -> (i32, i32) {
    %c0_i32 = arith.constant 0 : i32
    %c0_i32_0 = arith.constant 0 : i32
    %c0_i32_1 = arith.constant 0 : i32
    return %c0_i32, %c0_i32_0 : i32, i32
  }
  func.func @transform_4(%arg0: i32) -> (i32, i32, i32) {
    %c0_i32 = arith.constant 0 : i32
    %c0_i32_0 = arith.constant 0 : i32
    %c0_i32_1 = arith.constant 0 : i32
    %c0_i32_2 = arith.constant 0 : i32
    return %c0_i32, %c0_i32_0, %c0_i32_1 : i32, i32, i32
  }
  func.func @transform_5(%arg0: i32) -> (i32, i32) {
    %c0_i32 = arith.constant 0 : i32
    %c0_i32_0 = arith.constant 0 : i32
    %c0_i32_1 = arith.constant 0 : i32
    return %c0_i32, %c0_i32_0 : i32, i32
  }
  func.func @transform_6(%arg0: i32) -> (i32, i32) {
    %c0_i32 = arith.constant 0 : i32
    %c0_i32_0 = arith.constant 0 : i32
    %c0_i32_1 = arith.constant 0 : i32
    return %c0_i32, %c0_i32_0 : i32, i32
  }
  func.func @transform_7(%arg0: i32) -> (i32, i32, i32) {
    %c0_i32 = arith.constant 0 : i32
    %c0_i32_0 = arith.constant 0 : i32
    %c0_i32_1 = arith.constant 0 : i32
    return %arg0, %c0_i32, %c0_i32_0 : i32, i32, i32
  }
}

</mosaic_0001>

<bundles_post_ra>
// kernel: tpu_custom_call.1
= control target key start
LH: loop header
LB: loop body
LE: loop exit
PB: predicated region body
PF: predicated region fallthrough
CT: control target
= control target key end

     0   :  { %12 = vsyncpa [#allocation3], 0  ;;  %s7011_s0 = inlined_call_operand.vmem [shape: bf16[2,4,512,8], index: 0, kind: input, shape index: {}]   ;;  %s7012_s1 = inlined_call_operand.vmem [shape: f32[2,16,128], index: 1, kind: input, shape index: {}]   ;;  %s7013_s2 = inlined_call_operand.vmem [shape: bf16[8,128], index: 2, kind: input, shape index: {}]   ;;  %s7014_s3 = inlined_call_operand.vmem [shape: f32[128,128], index: 3, kind: input, shape index: {}]   ;;  %s7015_s4 = inlined_call_operand.vmem [shape: f32[1,64,128], index: 4, kind: input, shape index: {}]   ;;  %s7016_s5 = inlined_call_operand.vmem [shape: f32[128,128], index: 5, kind: input, shape index: {}]   ;;  %s7017_s6 = inlined_call_operand.vmem [shape: f32[8,128], index: 6, kind: input, shape index: {}]   ;;  %s7018_s7 = inlined_call_operand.hbm [shape: f32[2,8,128], index: 7, kind: output, shape index: {}]  }
   0x1   :  { %14 = vsyncpa [#allocation3 + $0x1], 0  ;;  %s6002_s24 = smov 0   ;;  %s6004_s25 = smov 0  }
   0x2   :  { %s6006_s26 = smov 0   ;;  %s6008_s27 = smov 0  }
   0x3 LB: > { %s6023_s28 = sadd.s32 4294967295, %s5956_s27   ;;  %s4574_s29 = sadd.s32 4294967294, %s5956_s27   ;;  %s5956_s27 = sphi %s6008_s27, %s7024_s27   ;;  %s5952_s26 = sphi %s6006_s26, %s7023_s26   ;;  %s5948_s25 = sphi %s6004_s25, %s7022_s25   ;;  %s5944_s24 = sphi %s6002_s24, %s7021_s24  }
   0x4   : > { %s6027_s30 = sadd.s32 1, %s5956_s27   ;;  %s184_s8 = sadd.s32 1, %s5952_s26 }
   0x5   : > { %s181_s9 = ssub.s32 %s5956_s27, %s6027_s30  ;;  %p194_p0 = scmp.ne.s32.totalorder %s5952_s26, %s5948_s25 }
   0x6   : > { %p182_p1 = scmp.eq.s32.totalorder %s181_s9, 0  ;;  %p195_p2 = scmp.eq.s32.totalorder %s6023_s28, 1 }
   0x7   : > { %p200_p3 = scmp.ne.s32.totalorder %s5948_s25, %s5944_s24  ;;  %p201_p4 = scmp.eq.s32.totalorder %s4574_s29, 1 }
   0x8   : > { %s6038_s10 = scalar_select %p182_p1, %s5952_s26, %s184_s8  }
   0x9   : > { %p6040_p5 = por %p195_p2, %p194_p0  ;;  %p6044_p6 = por %p201_p4, %p200_p3 }
   0xa   : > { %p4577_p7 = scmp.ge.s32.totalorder %s5956_s27, 1  ;;  %p250_p8 = scmp.lt.s32.totalorder %s5956_s27, 3 }
   0xc   : > { %p251_p9 = pnand %p4577_p7, %p250_p8 }
   0xd   : > { %v301_v0 = vld [vmem:[%s7014_s3] sm:$0xff] (!%p251_p9)  ;;  %v302_v1 = vld [vmem:[%s7014_s3 + $0x8] sm:$0xff] (!%p251_p9)  ;;  %vm437_vm0 = vcmask (!%p251_p9), 1043456   ;;  %p287_p10 = scmp.lt.s32.totalorder (!%p251_p9), %s6023_s28, 1  ;;  %v303_v5 = vld [vmem:[%s7014_s3 + $0x10] sm:$0xff] (!%p251_p9)  ;;  %vm424_vm1 = vcmask (!%p251_p9), 64512  }
   0xe   : > { %254 = sbr.rel (%p251_p9) target bundleno = 771 (0x303), region = 48  ;;  %v6059_v2 = vld [vmem:[%s7013_s2] sm:$0xf] (!%p251_p9)  ;;  %v5622_v3 = vpack.c.bf16 (!%p251_p9), %v302_v1, %v301_v0  ;;  %v304_v6 = vld [vmem:[%s7014_s3 + $0x18] sm:$0xff] (!%p251_p9)  ;;  %v306_v9 = vld [vmem:[%s7014_s3 + $0x28] sm:$0xff] (!%p251_p9)  ;;  %vm4388_vm2 = vcmask (!%p251_p9), 1040384  }
   0xf   : > { %5680 = vmatprep.subr.msk.bf16.mxu1 (!%p251_p9), %vm437_vm0, %v6059_v2  ;;  %v6066_v4 = vsel (!%p251_p9), %vm437_vm0, %v6059_v2, 0  ;;  %v5626_v7 = vpack.c.bf16 (!%p251_p9), %v304_v6, %v303_v5  ;;  %v305_v8 = vld [vmem:[%s7014_s3 + $0x20] sm:$0xff] (!%p251_p9)  ;;  %v307_v11 = vld [vmem:[%s7014_s3 + $0x30] sm:$0xff] (!%p251_p9)  ;;  %v308_v12 = vld [vmem:[%s7014_s3 + $0x38] sm:$0xff] (!%p251_p9)  ;;  %vm4390_vm3 = vcmask (!%p251_p9), 1041408   ;;  %vm5959_vm4 = vmmov (!%p251_p9), 0  }
  0x10   : > { %5268 = vmatpush3.bf16.msra.mxu1 (!%p251_p9), %v6066_v4  ;;  %5623 = vmatprep.subr.bf16.mxu0 (!%p251_p9), %v5622_v3  ;;  %v5630_v10 = vpack.c.bf16 (!%p251_p9), %v306_v9, %v305_v8  ;;  %v5634_v16 = vpack.c.bf16 (!%p251_p9), %v308_v12, %v307_v11  ;;  %v309_v17 = vld [vmem:[%s7014_s3 + $0x40] sm:$0xff] (!%p251_p9)  ;;  %v310_v18 = vld [vmem:[%s7014_s3 + $0x48] sm:$0xff] (!%p251_p9)  ;;  %v311_v20 = vld [vmem:[%s7014_s3 + $0x50] sm:$0xff] (!%p251_p9)  ;;  %vm4392_vm5 = vcmask (!%p251_p9), 1042432   ;;  %vm4395_vm6 = vcmask (!%p251_p9), 1044480   ;;  %s284_s13 = sand.u32 (!%p251_p9), 1, %s5948_s25  }
  0x11   : > { %5681 = vmatprep.subr.msk.bf16.mxu1 (!%p251_p9), %vm437_vm0, %v6059_v2  ;;  %5625 = vmatpush3.bf16.msra.mxu0 (!%p251_p9), %v5622_v3  ;;  %v5638_v21 = vpack.c.bf16 (!%p251_p9), %v310_v18, %v309_v17  ;;  %v312_v23 = vld [vmem:[%s7014_s3 + $0x58] sm:$0xff] (!%p251_p9)  ;;  %v313_v26 = vld [vmem:[%s7014_s3 + $0x60] sm:$0xff] (!%p251_p9)  ;;  %v314_v27 = vld [vmem:[%s7014_s3 + $0x68] sm:$0xff] (!%p251_p9)  ;;  %vm4397_vm7 = vcmask (!%p251_p9), 1045504   ;;  %vm4399_vm8 = vcmask (!%p251_p9), 1046528   ;;  %s5032_s16 = sshll.u32 (!%p251_p9), %s6023_s28, 7 }
  0x12   : > { %5627 = vmatprep.subr.bf16.mxu0 (!%p251_p9), %v5626_v7  ;;  %v5642_v25 = vpack.c.bf16 (!%p251_p9), %v312_v23, %v311_v20  ;;  %v315_v28 = vld [vmem:[%s7014_s3 + $0x70] sm:$0xff] (!%p251_p9)  ;;  %v316_v29 = vld [vmem:[%s7014_s3 + $0x78] sm:$0xff] (!%p251_p9)  ;;  %v5646_v31 = vpack.c.bf16 (!%p251_p9), %v314_v27, %v313_v26  ;;  %s6969_s21 = scalar_lea.hbm (!%p251_p9), %s7018_s7, %s5032_s16 }
  0x13   : > { %v5650_v33 = vpack.c.bf16 (!%p251_p9), %v316_v29, %v315_v28 }
  0x15   : > { %s288_s23 = scalar_select %p287_p10, %s6023_s28, 1  ;;  %5629 = vmatpush3.bf16.msra.mxu0 %v5626_v7 }
  0x16   : > { %5631 = vmatprep.subr.bf16.mxu0 %v5630_v10  ;;  %s5961_s28 = smov [#allocation2]  }
  0x17   : > { %s5035_s14 = sshll.u32 %s288_s23, 10  ;;  %s5036_s22 = sshll.u32 %s288_s23, 4 }
  0x18   : > { %s6087_s17 = scalar_lea.vmem %s7011_s0, %s5035_s14  ;;  %s6111_s15 = scalar_lea.vmem %s7012_s1, %s5036_s22 }
  0x19   : > { %v5755_v13 = vld [vmem:[%s6087_s17] sm:$0xff]   ;;  %v5756_v14 = vld [vmem:[%s6087_s17 + $0x8] sm:$0xff]   ;;  %v5757_v15 = vld [vmem:[%s6087_s17 + $0x10] sm:$0xff]   ;;  %5633 = vmatpush3.bf16.msra.mxu0 %v5630_v10  ;;  %s4578_s23 = sshll.u32 %s284_s13, 3  ;;  %s4490_s22 = scalar_lea.sflag [#allocation3], %s284_s13 }
  0x1a   : > { %5269 = vmatprep.mubr.msk.bf16.mxu1 %vm424_vm1, %v5755_v13  ;;  %v5758_v19 = vld [vmem:[%s6087_s17 + $0x18] sm:$0xff]   ;;  %5635 = vmatprep.subr.bf16.mxu0 %v5634_v16  ;;  %v299_v22 = vld [vmem:[%s6111_s15] sm:$0xff]  ;;  %v5760_v30 = vld [vmem:[%s6087_s17 + $0x108] sm:$0xff]   ;;  %s286_s18 = scalar_lea.vmem [#allocation2], %s4578_s23  ;;  %s5898_s8 = sshll.u32 %s5961_s28, 4  ;;  %s5899_s8 = int_to_ptr.vmem [resolvable:$false] %s5898_s8 }
  0x1b   : > { %5270 = vmatmul.mubr.msk.bf16.vlgmr.msra.gmra.mrb[0].mxu1 %vm424_vm1, %v5756_v14  ;;  %v5759_v24 = vld [vmem:[%s6087_s17 + $0x100] sm:$0xff]   ;;  %5264 = vmatprep.mubr.f32.mxu0 %v299_v22  ;;  %v5761_v32 = vld [vmem:[%s6087_s17 + $0x110] sm:$0xff]   ;;  %v5762_v34 = vld [vmem:[%s6087_s17 + $0x118] sm:$0xff]   ;;  %s5900_s9 = scalar_lea.vmem %s5899_s8, 256 }
  0x1c   : > { %5278 = vmatpush3.bf16.msra.mxu1 %v6066_v4  ;;  %5273 = vmatprep.mubr.msk.bf16.mxu1 %vm424_vm1, %v5757_v15  ;;  %v5765_v35 = vld [vmem:[%s6087_s17 + $0x210] sm:$0xff]   ;;  %v300_v36 = vld [vmem:[%s6111_s15 + $0x8] sm:$0xff]  ;;  %v5763_v37 = vld [vmem:[%s6087_s17 + $0x200] sm:$0xff]  }
  0x1d   : > { %5683 = vmatprep.subr.msk.bf16.mxu1 %vm437_vm0, %v6059_v2  ;;  %5637 = vmatpush3.bf16.msra.mxu0 %v5634_v16  ;;  %v5764_v38 = vld [vmem:[%s6087_s17 + $0x208] sm:$0xff]   ;;  %v5769_v39 = vld [vmem:[%s6087_s17 + $0x20] sm:$0xff]   ;;  %v5766_v40 = vld [vmem:[%s6087_s17 + $0x218] sm:$0xff]  }
  0x1e   : > { %5639 = vmatprep.subr.bf16.mxu0 %v5638_v21  ;;  %v5767_v41 = vld [vmem:[%s6087_s17 + $0x300] sm:$0xff]   ;;  %v5770_v42 = vld [vmem:[%s6087_s17 + $0x28] sm:$0xff]   ;;  %v5773_v43 = vld [vmem:[%s6087_s17 + $0x30] sm:$0xff]  }
  0x1f   : > { %v5768_v44 = vld [vmem:[%s6087_s17 + $0x308] sm:$0xff]   ;;  %v5771_v45 = vld [vmem:[%s6087_s17 + $0x310] sm:$0xff]   ;;  %v5774_v46 = vld [vmem:[%s6087_s17 + $0x38] sm:$0xff]  }
  0x20   : > { %v5777_v47 = vld [vmem:[%s6087_s17 + $0x220] sm:$0xff]   ;;  %v5772_v48 = vld [vmem:[%s6087_s17 + $0x318] sm:$0xff]   ;;  %v5778_v50 = vld [vmem:[%s6087_s17 + $0x228] sm:$0xff]  }
  0x21   : > { %5641 = vmatpush3.bf16.msra.mxu0 %v5638_v21  ;;  %v5775_v49 = vld [vmem:[%s6087_s17 + $0x120] sm:$0xff]   ;;  %v5781_v51 = vld [vmem:[%s6087_s17 + $0x230] sm:$0xff]   ;;  %v5776_v52 = vld [vmem:[%s6087_s17 + $0x128] sm:$0xff]  }
  0x22   : > { %5643 = vmatprep.subr.bf16.mxu0 %v5642_v25  ;;  %v5779_v53 = vld [vmem:[%s6087_s17 + $0x130] sm:$0xff]   ;;  %v5782_v54 = vld [vmem:[%s6087_s17 + $0x238] sm:$0xff]   ;;  %v5785_v55 = vld [vmem:[%s6087_s17 + $0x40] sm:$0xff]  }
  0x23   : > { %5274 = vmatmul.mubr.msk.bf16.gmra.mrb[4].mxu1 %vm424_vm1, %v5758_v19  ;;  %v5780_v56 = vld [vmem:[%s6087_s17 + $0x138] sm:$0xff]   ;;  %v5783_v57 = vld [vmem:[%s6087_s17 + $0x320] sm:$0xff]   ;;  %v5786_v58 = vld [vmem:[%s6087_s17 + $0x48] sm:$0xff]  }
  0x24   : > { %5279 = vmatprep.mubr.msk.bf16.mxu1 %vm424_vm1, %v5759_v24  ;;  %v5789_v59 = vld [vmem:[%s6087_s17 + $0x50] sm:$0xff]   ;;  %v5784_v60 = vld [vmem:[%s6087_s17 + $0x328] sm:$0xff]   ;;  %v5790_v62 = vld [vmem:[%s6087_s17 + $0x58] sm:$0xff]  }
  0x25   : > { %5645 = vmatpush3.bf16.msra.mxu0 %v5642_v25  ;;  %v5787_v61 = vld [vmem:[%s6087_s17 + $0x330] sm:$0xff]   ;;  %v5793_v63 = vld [vmem:[%s6087_s17 + $0x240] sm:$0xff]   ;;  %v5788_v0 = vld [vmem:[%s6087_s17 + $0x338] sm:$0xff]  }
  0x26   : > { %5647 = vmatprep.subr.bf16.mxu0 %v5646_v31  ;;  %v5791_v1 = vld [vmem:[%s6087_s17 + $0x140] sm:$0xff]   ;;  %v5794_v3 = vld [vmem:[%s6087_s17 + $0x248] sm:$0xff]   ;;  %v5797_v5 = vld [vmem:[%s6087_s17 + $0x250] sm:$0xff]  }
  0x27   : > { %v5792_v6 = vld [vmem:[%s6087_s17 + $0x148] sm:$0xff]   ;;  %v5795_v7 = vld [vmem:[%s6087_s17 + $0x150] sm:$0xff]   ;;  %v5798_v8 = vld [vmem:[%s6087_s17 + $0x258] sm:$0xff]  }
  0x28   : > { %v5801_v9 = vld [vmem:[%s6087_s17 + $0x60] sm:$0xff]   ;;  %v5796_v10 = vld [vmem:[%s6087_s17 + $0x158] sm:$0xff]   ;;  %v5802_v12 = vld [vmem:[%s6087_s17 + $0x68] sm:$0xff]  }
  0x29   : > { %5649 = vmatpush3.bf16.msra.mxu0 %v5646_v31  ;;  %v5799_v11 = vld [vmem:[%s6087_s17 + $0x340] sm:$0xff]   ;;  %v5805_v13 = vld [vmem:[%s6087_s17 + $0x70] sm:$0xff]   ;;  %v5800_v14 = vld [vmem:[%s6087_s17 + $0x348] sm:$0xff]  }
  0x2a   : > { %5651 = vmatprep.subr.bf16.mxu0 %v5650_v33  ;;  %v5803_v15 = vld [vmem:[%s6087_s17 + $0x350] sm:$0xff]   ;;  %v5806_v16 = vld [vmem:[%s6087_s17 + $0x78] sm:$0xff]   ;;  %v5809_v17 = vld [vmem:[%s6087_s17 + $0x260] sm:$0xff]  }
  0x2b   : > { %5280 = vmatmul.mubr.msk.bf16.vlgmr.msra.gmra.mrb[8].mxu1 %vm424_vm1, %v5760_v30  ;;  %v5804_v18 = vld [vmem:[%s6087_s17 + $0x358] sm:$0xff]   ;;  %v5807_v19 = vld [vmem:[%s6087_s17 + $0x160] sm:$0xff]   ;;  %v5810_v20 = vld [vmem:[%s6087_s17 + $0x268] sm:$0xff]  }
  0x2c   : > { %5679 = vmatpush3.bf16.msra.mxu1 %v6066_v4  ;;  %5283 = vmatprep.mubr.msk.bf16.mxu1 %vm424_vm1, %v5761_v32  ;;  %v5808_v21 = vld [vmem:[%s6087_s17 + $0x168] sm:$0xff]   ;;  %v5813_v22 = vld [vmem:[%s6087_s17 + $0x270] sm:$0xff]   ;;  %v5814_v24 = vld [vmem:[%s6087_s17 + $0x278] sm:$0xff]  }
  0x2d   : > { %5684 = vmatprep.subr.msk.bf16.mxu1 %vm437_vm0, %v6059_v2  ;;  %5653 = vmatpush3.bf16.msra.mxu0 %v5650_v33  ;;  %v5811_v23 = vld [vmem:[%s6087_s17 + $0x170] sm:$0xff]   ;;  %v5817_v25 = vld [vmem:[%s6087_s17 + $0x80] sm:$0xff]   ;;  %v5812_v26 = vld [vmem:[%s6087_s17 + $0x178] sm:$0xff]  }
  0x2e   : > { %5682 = vmatprep.subr.msk.bf16.mxu0 %vm437_vm0, %v6059_v2  ;;  %v5815_v27 = vld [vmem:[%s6087_s17 + $0x360] sm:$0xff]   ;;  %v5818_v28 = vld [vmem:[%s6087_s17 + $0x88] sm:$0xff]   ;;  %v5821_v29 = vld [vmem:[%s6087_s17 + $0x90] sm:$0xff]  }
  0x2f   : > { %v5816_v30 = vld [vmem:[%s6087_s17 + $0x368] sm:$0xff]   ;;  %v5819_v31 = vld [vmem:[%s6087_s17 + $0x370] sm:$0xff]   ;;  %v5822_v32 = vld [vmem:[%s6087_s17 + $0x98] sm:$0xff]  }
  0x30   : > { %5265 = vmatmul.mubr.f32.vlgmr.msra.gmra.mrb[0].mxu0 %v300_v36  ;;  %v5825_v33 = vld [vmem:[%s6087_s17 + $0x280] sm:$0xff]   ;;  %v5826_v36 = vld [vmem:[%s6087_s17 + $0x288] sm:$0xff]  }
  0x31   : > { %5288 = vmatpush3.bf16.msra.mxu0 %v6066_v4  ;;  %5289 = vmatprep.mubr.msk.bf16.mxu0 %vm424_vm1, %v5763_v37  ;;  %v5829_v37 = vld [vmem:[%s6087_s17 + $0x290] sm:$0xff]  }
  0x32   : > { %5685 = vmatprep.subr.msk.bf16.mxu0 %vm437_vm0, %v6059_v2 }
  0x33   : > { %5284 = vmatmul.mubr.msk.bf16.gmra.mrb[12].mxu1 %vm424_vm1, %v5762_v34  ;;  %v5820_v34 = vld [vmem:[%s6087_s17 + $0x378] sm:$0xff]  }
  0x34   : > { %5293 = vmatprep.mubr.msk.bf16.mxu1 %vm424_vm1, %v5765_v35  ;;  %5290 = vmatmul.mubr.msk.bf16.vlgmr.msra.gmra.mrb[4].mxu0 %vm424_vm1, %v5764_v38  ;;  %v5823_v35 = vld [vmem:[%s6087_s17 + $0x180] sm:$0xff]   ;;  %v5824_v38 = vld [vmem:[%s6087_s17 + $0x188] sm:$0xff]  }
  0x35   : > { %5308 = vmatpush3.bf16.msra.mxu0 %v6066_v4  ;;  %5309 = vmatprep.mubr.msk.bf16.mxu0 %vm424_vm1, %v5769_v39  ;;  %v5827_v39 = vld [vmem:[%s6087_s17 + $0x190] sm:$0xff]  }
  0x36   : > { %5687 = vmatprep.subr.msk.bf16.mxu0 %vm437_vm0, %v6059_v2 }
  0x3b   : > { %5294 = vmatmul.mubr.msk.bf16.vlgmr.msra.gmra.mrb[16].mxu1 %vm424_vm1, %v5766_v40  ;;  %v5830_v40 = vld [vmem:[%s6087_s17 + $0x298] sm:$0xff]  }
  0x3c   : > { %5298 = vmatpush3.bf16.msra.mxu1 %v6066_v4  ;;  %5299 = vmatprep.mubr.msk.bf16.mxu1 %vm424_vm1, %v5767_v41  ;;  %v5833_v41 = vld [vmem:[%s6087_s17 + $0xa0] sm:$0xff]  }
  0x3d   : > { %5686 = vmatprep.subr.msk.bf16.mxu1 %vm437_vm0, %v6059_v2  ;;  %5310 = vmatmul.mubr.msk.bf16.vlgmr.msra.gmra.mrb[8].mxu0 %vm424_vm1, %v5770_v42  ;;  %v5828_v42 = vld [vmem:[%s6087_s17 + $0x198] sm:$0xff]  }
  0x3e   : > { %5313 = vmatprep.mubr.msk.bf16.mxu0 %vm424_vm1, %v5773_v43  ;;  %5328 = vmatpush3.bf16.msra.mxu0 %v6066_v4  ;;  %v5831_v43 = vld [vmem:[%s6087_s17 + $0x380] sm:$0xff]  }
  0x3f   : > { %5689 = vmatprep.subr.msk.bf16.mxu0 %vm437_vm0, %v6059_v2 }
  0x43   : > { %5300 = vmatmul.mubr.msk.bf16.vlgmr.msra.gmra.mrb[20].mxu1 %vm424_vm1, %v5768_v44  ;;  %v5834_v44 = vld [vmem:[%s6087_s17 + $0xa8] sm:$0xff]  }
  0x44   : > { %5318 = vmatpush3.bf16.msra.mxu1 %v6066_v4  ;;  %5303 = vmatprep.mubr.msk.bf16.mxu1 %vm424_vm1, %v5771_v45  ;;  %v5837_v45 = vld [vmem:[%s6087_s17 + $0xb0] sm:$0xff]  }
  0x45   : > { %5688 = vmatprep.subr.msk.bf16.mxu1 %vm437_vm0, %v6059_v2  ;;  %5314 = vmatmul.mubr.msk.bf16.gmra.mrb[12].mxu0 %vm424_vm1, %v5774_v46  ;;  %v5832_v46 = vld [vmem:[%s6087_s17 + $0x388] sm:$0xff]  }
  0x46   : > { %5329 = vmatprep.mubr.msk.bf16.mxu0 %vm424_vm1, %v5777_v47  ;;  %v5835_v47 = vld [vmem:[%s6087_s17 + $0x390] sm:$0xff]  }
  0x4b   : > { %5304 = vmatmul.mubr.msk.bf16.gmra.mrb[24].mxu1 %vm424_vm1, %v5772_v48  ;;  %v5838_v48 = vld [vmem:[%s6087_s17 + $0xb8] sm:$0xff]  }
  0x4c   : > { %5319 = vmatprep.mubr.msk.bf16.mxu1 %vm424_vm1, %v5775_v49  ;;  %v5841_v49 = vld [vmem:[%s6087_s17 + $0x2a0] sm:$0xff]  }
  0x4d   : > { %5330 = vmatmul.mubr.msk.bf16.vlgmr.msra.gmra.mrb[16].mxu0 %vm424_vm1, %v5778_v50  ;;  %v5836_v50 = vld [vmem:[%s6087_s17 + $0x398] sm:$0xff]  }
  0x4e   : > { %5333 = vmatprep.mubr.msk.bf16.mxu0 %vm424_vm1, %v5781_v51  ;;  %5348 = vmatpush3.bf16.msra.mxu0 %v6066_v4  ;;  %v5839_v51 = vld [vmem:[%s6087_s17 + $0x1a0] sm:$0xff]  }
  0x4f   : > { %5691 = vmatprep.subr.msk.bf16.mxu0 %vm437_vm0, %v6059_v2 }
  0x53   : > { %5320 = vmatmul.mubr.msk.bf16.vlgmr.msra.gmra.mrb[28].mxu1 %vm424_vm1, %v5776_v52  ;;  %v5842_v52 = vld [vmem:[%s6087_s17 + $0x2a8] sm:$0xff]  }
  0x54   : > { %5338 = vmatpush3.bf16.msra.mxu1 %v6066_v4  ;;  %5323 = vmatprep.mubr.msk.bf16.mxu1 %vm424_vm1, %v5779_v53  ;;  %v5845_v53 = vld [vmem:[%s6087_s17 + $0x2b0] sm:$0xff]  }
  0x55   : > { %5690 = vmatprep.subr.msk.bf16.mxu1 %vm437_vm0, %v6059_v2  ;;  %5334 = vmatmul.mubr.msk.bf16.gmra.mrb[20].mxu0 %vm424_vm1, %v5782_v54  ;;  %v5840_v54 = vld [vmem:[%s6087_s17 + $0x1a8] sm:$0xff]  }
  0x56   : > { %5349 = vmatprep.mubr.msk.bf16.mxu0 %vm424_vm1, %v5785_v55  ;;  %v5843_v55 = vld [vmem:[%s6087_s17 + $0x1b0] sm:$0xff]  }
  0x5b   : > { %5324 = vmatmul.mubr.msk.bf16.gmra.mrb[32].mxu1 %vm424_vm1, %v5780_v56  ;;  %v5846_v56 = vld [vmem:[%s6087_s17 + $0x2b8] sm:$0xff]  }
  0x5c   : > { %5339 = vmatprep.mubr.msk.bf16.mxu1 %vm424_vm1, %v5783_v57  ;;  %v5849_v57 = vld [vmem:[%s6087_s17 + $0xc0] sm:$0xff]  }
  0x5d   : > { %5350 = vmatmul.mubr.msk.bf16.vlgmr.msra.gmra.mrb[24].mxu0 %vm424_vm1, %v5786_v58  ;;  %v5844_v58 = vld [vmem:[%s6087_s17 + $0x1b8] sm:$0xff]  }
  0x5e   : > { %5353 = vmatprep.mubr.msk.bf16.mxu0 %vm424_vm1, %v5789_v59  ;;  %5368 = vmatpush3.bf16.msra.mxu0 %v6066_v4  ;;  %v5847_v59 = vld [vmem:[%s6087_s17 + $0x3a0] sm:$0xff]  }
  0x5f   : > { %5693 = vmatprep.subr.msk.bf16.mxu0 %vm437_vm0, %v6059_v2 }
  0x63   : > { %5340 = vmatmul.mubr.msk.bf16.vlgmr.msra.gmra.mrb[36].mxu1 %vm424_vm1, %v5784_v60  ;;  %v5850_v60 = vld [vmem:[%s6087_s17 + $0xc8] sm:$0xff]  }
  0x64   : > { %5358 = vmatpush3.bf16.msra.mxu1 %v6066_v4  ;;  %5343 = vmatprep.mubr.msk.bf16.mxu1 %vm424_vm1, %v5787_v61  ;;  %v5853_v61 = vld [vmem:[%s6087_s17 + $0xd0] sm:$0xff]  }
  0x65   : > { %5692 = vmatprep.subr.msk.bf16.mxu1 %vm437_vm0, %v6059_v2  ;;  %5354 = vmatmul.mubr.msk.bf16.gmra.mrb[28].mxu0 %vm424_vm1, %v5790_v62  ;;  %v5848_v62 = vld [vmem:[%s6087_s17 + $0x3a8] sm:$0xff]  }
  0x66   : > { %5369 = vmatprep.mubr.msk.bf16.mxu0 %vm424_vm1, %v5793_v63  ;;  %v5851_v63 = vld [vmem:[%s6087_s17 + $0x3b0] sm:$0xff]  }
  0x6b   : > { %5344 = vmatmul.mubr.msk.bf16.gmra.mrb[40].mxu1 %vm424_vm1, %v5788_v0  ;;  %v5854_v0 = vld [vmem:[%s6087_s17 + $0xd8] sm:$0xff]  }
  0x6c   : > { %5359 = vmatprep.mubr.msk.bf16.mxu1 %vm424_vm1, %v5791_v1  ;;  %v5857_v1 = vld [vmem:[%s6087_s17 + $0x2c0] sm:$0xff]  }
  0x6d   : > { %5370 = vmatmul.mubr.msk.bf16.vlgmr.msra.gmra.mrb[32].mxu0 %vm424_vm1, %v5794_v3  ;;  %v5852_v3 = vld [vmem:[%s6087_s17 + $0x3b8] sm:$0xff]  }
  0x6e   : > { %5373 = vmatprep.mubr.msk.bf16.mxu0 %vm424_vm1, %v5797_v5  ;;  %5388 = vmatpush3.bf16.msra.mxu0 %v6066_v4  ;;  %v5855_v5 = vld [vmem:[%s6087_s17 + $0x1c0] sm:$0xff]  }
  0x6f   : > { %5695 = vmatprep.subr.msk.bf16.mxu0 %vm437_vm0, %v6059_v2 }
  0x73   : > { %5360 = vmatmul.mubr.msk.bf16.vlgmr.msra.gmra.mrb[44].mxu1 %vm424_vm1, %v5792_v6  ;;  %v5858_v6 = vld [vmem:[%s6087_s17 + $0x2c8] sm:$0xff]  }
  0x74   : > { %5378 = vmatpush3.bf16.msra.mxu1 %v6066_v4  ;;  %5363 = vmatprep.mubr.msk.bf16.mxu1 %vm424_vm1, %v5795_v7 }
  0x75   : > { %5694 = vmatprep.subr.msk.bf16.mxu1 %vm437_vm0, %v6059_v2  ;;  %5374 = vmatmul.mubr.msk.bf16.gmra.mrb[36].mxu0 %vm424_vm1, %v5798_v8  ;;  %v5861_v8 = vld [vmem:[%s6087_s17 + $0x2d0] sm:$0xff]  }
  0x76   : > { %5389 = vmatprep.mubr.msk.bf16.mxu0 %vm424_vm1, %v5801_v9 }
  0x7b   : > { %5364 = vmatmul.mubr.msk.bf16.gmra.mrb[48].mxu1 %vm424_vm1, %v5796_v10  ;;  %v5856_v10 = vld [vmem:[%s6087_s17 + $0x1c8] sm:$0xff]  }
  0x7c   : > { %5379 = vmatprep.mubr.msk.bf16.mxu1 %vm424_vm1, %v5799_v11 }
  0x7d   : > { %5390 = vmatmul.mubr.msk.bf16.vlgmr.msra.gmra.mrb[40].mxu0 %vm424_vm1, %v5802_v12  ;;  %v5859_v12 = vld [vmem:[%s6087_s17 + $0x1d0] sm:$0xff]  }
  0x7e   : > { %5393 = vmatprep.mubr.msk.bf16.mxu0 %vm424_vm1, %v5805_v13  ;;  %5408 = vmatpush3.bf16.msra.mxu0 %v6066_v4 }
  0x7f   : > { %5697 = vmatprep.subr.msk.bf16.mxu0 %vm437_vm0, %v6059_v2 }
  0x83   : > { %5380 = vmatmul.mubr.msk.bf16.vlgmr.msra.gmra.mrb[52].mxu1 %vm424_vm1, %v5800_v14  ;;  %v5862_v14 = vld [vmem:[%s6087_s17 + $0x2d8] sm:$0xff]  }
  0x84   : > { %5398 = vmatpush3.bf16.msra.mxu1 %v6066_v4  ;;  %5383 = vmatprep.mubr.msk.bf16.mxu1 %vm424_vm1, %v5803_v15 }
  0x85   : > { %5696 = vmatprep.subr.msk.bf16.mxu1 %vm437_vm0, %v6059_v2  ;;  %5394 = vmatmul.mubr.msk.bf16.gmra.mrb[44].mxu0 %vm424_vm1, %v5806_v16  ;;  %v5865_v16 = vld [vmem:[%s6087_s17 + $0xe0] sm:$0xff]  }
  0x86   : > { %5409 = vmatprep.mubr.msk.bf16.mxu0 %vm424_vm1, %v5809_v17 }
  0x8b   : > { %5384 = vmatmul.mubr.msk.bf16.gmra.mrb[56].mxu1 %vm424_vm1, %v5804_v18  ;;  %v5860_v18 = vld [vmem:[%s6087_s17 + $0x1d8] sm:$0xff]  }
  0x8c   : > { %5399 = vmatprep.mubr.msk.bf16.mxu1 %vm424_vm1, %v5807_v19 }
  0x8d   : > { %5410 = vmatmul.mubr.msk.bf16.vlgmr.msra.gmra.mrb[48].mxu0 %vm424_vm1, %v5810_v20  ;;  %v5863_v20 = vld [vmem:[%s6087_s17 + $0x3c0] sm:$0xff]  }
  0x8e   : > { %5413 = vmatprep.mubr.msk.bf16.mxu0 %vm424_vm1, %v5813_v22  ;;  %5428 = vmatpush3.bf16.msra.mxu0 %v6066_v4  ;;  %v5866_v22 = vld [vmem:[%s6087_s17 + $0xe8] sm:$0xff]  }
  0x8f   : > { %5699 = vmatprep.subr.msk.bf16.mxu0 %vm437_vm0, %v6059_v2 }
  0x93   : > { %5400 = vmatmul.mubr.msk.bf16.vlgmr.msra.gmra.mrb[60].mxu1 %vm424_vm1, %v5808_v21 }
  0x94   : > { %5418 = vmatpush3.bf16.msra.mxu1 %v6066_v4  ;;  %5403 = vmatprep.mubr.msk.bf16.mxu1 %vm424_vm1, %v5811_v23 }
  0x95   : > { %5698 = vmatprep.subr.msk.bf16.mxu1 %vm437_vm0, %v6059_v2  ;;  %5414 = vmatmul.mubr.msk.bf16.gmra.mrb[52].mxu0 %vm424_vm1, %v5814_v24  ;;  %v5869_v24 = vld [vmem:[%s6087_s17 + $0xf0] sm:$0xff]  }
  0x96   : > { %5429 = vmatprep.mubr.msk.bf16.mxu0 %vm424_vm1, %v5817_v25 }
  0x9b   : > { %5404 = vmatmul.mubr.msk.bf16.gmra.mrb[64].mxu1 %vm424_vm1, %v5812_v26 }
  0x9c   : > { %5419 = vmatprep.mubr.msk.bf16.mxu1 %vm424_vm1, %v5815_v27  ;;  %v5864_v27 = vld [vmem:[%s6087_s17 + $0x3c8] sm:$0xff]  }
  0x9d   : > { %5430 = vmatmul.mubr.msk.bf16.vlgmr.msra.gmra.mrb[56].mxu0 %vm424_vm1, %v5818_v28 }
  0x9e   : > { %5433 = vmatprep.mubr.msk.bf16.mxu0 %vm424_vm1, %v5821_v29  ;;  %5448 = vmatpush3.bf16.msra.mxu0 %v6066_v4 }
  0x9f   : > { %5701 = vmatprep.subr.msk.bf16.mxu0 %vm437_vm0, %v6059_v2 }
  0xa3   : > { %5420 = vmatmul.mubr.msk.bf16.vlgmr.msra.gmra.mrb[68].mxu1 %vm424_vm1, %v5816_v30  ;;  %v5867_v30 = vld [vmem:[%s6087_s17 + $0x3d0] sm:$0xff]  }
  0xa4   : > { %5438 = vmatpush3.bf16.msra.mxu1 %v6066_v4  ;;  %5423 = vmatprep.mubr.msk.bf16.mxu1 %vm424_vm1, %v5819_v31 }
  0xa5   : > { %5700 = vmatprep.subr.msk.bf16.mxu1 %vm437_vm0, %v6059_v2  ;;  %5434 = vmatmul.mubr.msk.bf16.gmra.mrb[60].mxu0 %vm424_vm1, %v5822_v32 }
  0xa6   : > { %5449 = vmatprep.mubr.msk.bf16.mxu0 %vm424_vm1, %v5825_v33 }
  0xab   : > { %5424 = vmatmul.mubr.msk.bf16.gmra.mrb[72].mxu1 %vm424_vm1, %v5820_v34  ;;  %v5870_v34 = vld [vmem:[%s6087_s17 + $0xf8] sm:$0xff]  }
  0xac   : > { %5439 = vmatprep.mubr.msk.bf16.mxu1 %vm424_vm1, %v5823_v35 }
  0xad   : > { %5450 = vmatmul.mubr.msk.bf16.vlgmr.msra.gmra.mrb[64].mxu0 %vm424_vm1, %v5826_v36  ;;  %v5873_v36 = vld [vmem:[%s6087_s17 + $0x2e0] sm:$0xff]  }
  0xae   : > { %5453 = vmatprep.mubr.msk.bf16.mxu0 %vm424_vm1, %v5829_v37  ;;  %5468 = vmatpush3.bf16.msra.mxu0 %v6066_v4 }
  0xaf   : > { %5703 = vmatprep.subr.msk.bf16.mxu0 %vm437_vm0, %v6059_v2 }
  0xb3   : > { %5440 = vmatmul.mubr.msk.bf16.vlgmr.msra.gmra.mrb[76].mxu1 %vm424_vm1, %v5824_v38 }
  0xb4   : > { %5458 = vmatpush3.bf16.msra.mxu1 %v6066_v4  ;;  %5443 = vmatprep.mubr.msk.bf16.mxu1 %vm424_vm1, %v5827_v39  ;;  %v5868_v39 = vld [vmem:[%s6087_s17 + $0x3d8] sm:$0xff]  }
  0xb5   : > { %5702 = vmatprep.subr.msk.bf16.mxu1 %vm437_vm0, %v6059_v2  ;;  %5454 = vmatmul.mubr.msk.bf16.gmra.mrb[68].mxu0 %vm424_vm1, %v5830_v40  ;;  %v6358_v2 = vld [vmem:[%s7013_s2] sm:$0xf] }
  0xb6   : > { %5469 = vmatprep.mubr.msk.bf16.mxu0 %vm424_vm1, %v5833_v41 }
  0xbb   : > { %5444 = vmatmul.mubr.msk.bf16.gmra.mrb[80].mxu1 %vm424_vm1, %v5828_v42 }
  0xbc   : > { %5459 = vmatprep.mubr.msk.bf16.mxu1 %vm424_vm1, %v5831_v43  ;;  %v5871_v43 = vld [vmem:[%s6087_s17 + $0x1e0] sm:$0xff]  }
  0xbd   : > { %5470 = vmatmul.mubr.msk.bf16.vlgmr.msra.gmra.mrb[72].mxu0 %vm424_vm1, %v5834_v44 }
  0xbe   : > { %5473 = vmatprep.mubr.msk.bf16.mxu0 %vm424_vm1, %v5837_v45  ;;  %5488 = vmatpush3.bf16.msra.mxu0 %v6066_v4  ;;  %v848_v45 = vlaneseq }
  0xbf   : > { %5705 = vmatprep.subr.msk.bf16.mxu0 %vm437_vm0, %v6358_v2 }
  0xc3   : > { %5460 = vmatmul.mubr.msk.bf16.vlgmr.msra.gmra.mrb[84].mxu1 %vm424_vm1, %v5832_v46 }
  0xc4   : > { %5478 = vmatpush3.bf16.msra.mxu1 %v6066_v4  ;;  %5463 = vmatprep.mubr.msk.bf16.mxu1 %vm424_vm1, %v5835_v47 }
  0xc5   : > { %5704 = vmatprep.subr.msk.bf16.mxu1 %vm437_vm0, %v6358_v2  ;;  %5474 = vmatmul.mubr.msk.bf16.gmra.mrb[76].mxu0 %vm424_vm1, %v5838_v48 }
  0xc6   : > { %5489 = vmatprep.mubr.msk.bf16.mxu0 %vm424_vm1, %v5841_v49 }
  0xcb   : > { %5464 = vmatmul.mubr.msk.bf16.gmra.mrb[88].mxu1 %vm424_vm1, %v5836_v50 }
  0xcc   : > { %5479 = vmatprep.mubr.msk.bf16.mxu1 %vm424_vm1, %v5839_v51  ;;  %v6488_v51 = vshrl.u32 %v848_v45, 7 }
  0xcd   : > { %5490 = vmatmul.mubr.msk.bf16.vlgmr.msra.gmra.mrb[80].mxu0 %vm424_vm1, %v5842_v52 }
  0xce   : > { %5493 = vmatprep.mubr.msk.bf16.mxu0 %vm424_vm1, %v5845_v53  ;;  %5508 = vmatpush3.bf16.msra.mxu0 %v6066_v4 }
  0xcf   : > { %5707 = vmatprep.subr.msk.bf16.mxu0 %vm437_vm0, %v6358_v2 }
  0xd3   : > { %5480 = vmatmul.mubr.msk.bf16.vlgmr.msra.gmra.mrb[92].mxu1 %vm424_vm1, %v5840_v54  ;;  %v5874_v54 = vld [vmem:[%s6087_s17 + $0x2e8] sm:$0xff]  }
  0xd4   : > { %5498 = vmatpush3.bf16.msra.mxu1 %v6066_v4  ;;  %5483 = vmatprep.mubr.msk.bf16.mxu1 %vm424_vm1, %v5843_v55 }
  0xd5   : > { %5706 = vmatprep.subr.msk.bf16.mxu1 %vm437_vm0, %v6358_v2  ;;  %5494 = vmatmul.mubr.msk.bf16.gmra.mrb[84].mxu0 %vm424_vm1, %v5846_v56 }
  0xd6   : > { %5509 = vmatprep.mubr.msk.bf16.mxu0 %vm424_vm1, %v5849_v57 }
  0xdb   : > { %5484 = vmatmul.mubr.msk.bf16.gmra.mrb[96].mxu1 %vm424_vm1, %v5844_v58 }
  0xdc   : > { %5499 = vmatprep.mubr.msk.bf16.mxu1 %vm424_vm1, %v5847_v59  ;;  %v5877_v59 = vld [vmem:[%s6087_s17 + $0x2f0] sm:$0xff]  }
  0xdd   : > { %5510 = vmatmul.mubr.msk.bf16.vlgmr.msra.gmra.mrb[88].mxu0 %vm424_vm1, %v5850_v60 }
  0xde   : > { %5513 = vmatprep.mubr.msk.bf16.mxu0 %vm424_vm1, %v5853_v61  ;;  %5528 = vmatpush3.bf16.msra.mxu0 %v6066_v4 }
  0xdf   : > { %5709 = vmatprep.subr.msk.bf16.mxu0 %vm437_vm0, %v6358_v2 }
  0xe3   : > { %5500 = vmatmul.mubr.msk.bf16.vlgmr.msra.gmra.mrb[100].mxu1 %vm424_vm1, %v5848_v62 }
  0xe4   : > { %5518 = vmatpush3.bf16.msra.mxu1 %v6066_v4  ;;  %5503 = vmatprep.mubr.msk.bf16.mxu1 %vm424_vm1, %v5851_v63 }
  0xe5   : > { %5708 = vmatprep.subr.msk.bf16.mxu1 %vm437_vm0, %v6358_v2  ;;  %5514 = vmatmul.mubr.msk.bf16.gmra.mrb[92].mxu0 %vm424_vm1, %v5854_v0  ;;  %v5872_v0 = vld [vmem:[%s6087_s17 + $0x1e8] sm:$0xff]  }
  0xe6   : > { %5529 = vmatprep.mubr.msk.bf16.mxu0 %vm424_vm1, %v5857_v1 }
  0xeb   : > { %5504 = vmatmul.mubr.msk.bf16.gmra.mrb[104].mxu1 %vm424_vm1, %v5852_v3 }
  0xec   : > { %5519 = vmatprep.mubr.msk.bf16.mxu1 %vm424_vm1, %v5855_v5 }
  0xed   : > { %5530 = vmatmul.mubr.msk.bf16.vlgmr.msra.gmra.mrb[96].mxu0 %vm424_vm1, %v5858_v6  ;;  %v5875_v6 = vld [vmem:[%s6087_s17 + $0x1f0] sm:$0xff]  }
  0xee   : > { %v6419_v7 = vpop.f32.mrb[0].mxu1  ;;  %5533 = vmatprep.mubr.msk.bf16.mxu0 %vm424_vm1, %v5861_v8  ;;  %5548 = vmatpush3.bf16.msra.mxu0 %v6066_v4 }
  0xef   : > { %v6422_v9 = vpop.f32.mrb[1].mxu1  ;;  %5711 = vmatprep.subr.msk.bf16.mxu0 %vm437_vm0, %v6358_v2 }
  0xf0   : > { %v6425_v11 = vpop.f32.mrb[2].mxu1 }
  0xf1   : > { %v6428_v13 = vpop.f32.mrb[3].mxu1 }
  0xf3   : > { %5520 = vmatmul.mubr.msk.bf16.vlgmr.msra.gmra.mrb[108].mxu1 %vm424_vm1, %v5856_v10 }
  0xf4   : > { %5538 = vmatpush3.bf16.msra.mxu1 %v6066_v4  ;;  %5523 = vmatprep.mubr.msk.bf16.mxu1 %vm424_vm1, %v5859_v12 }
  0xf5   : > { %5710 = vmatprep.subr.msk.bf16.mxu1 %vm437_vm0, %v6358_v2  ;;  %5534 = vmatmul.mubr.msk.bf16.gmra.mrb[100].mxu0 %vm424_vm1, %v5862_v14 }
  0xf6   : > { %v6441_v15 = vpop.f32.mrb[4].mxu1  ;;  %5549 = vmatprep.mubr.msk.bf16.mxu0 %vm424_vm1, %v5865_v16 }
  0xf7   : > { %v6444_v17 = vpop.f32.mrb[5].mxu1 }
  0xf8   : > { %v6447_v19 = vpop.f32.mrb[6].mxu1 }
  0xf9   : > { %v6450_v21 = vpop.f32.mrb[7].mxu1 }
  0xfb   : > { %5524 = vmatmul.mubr.msk.bf16.gmra.mrb[112].mxu1 %vm424_vm1, %v5860_v18 }
  0xfc   : > { %5539 = vmatprep.mubr.msk.bf16.mxu1 %vm424_vm1, %v5863_v20 }
  0xfd   : > { %5550 = vmatmul.mubr.msk.bf16.vlgmr.msra.gmra.mrb[104].mxu0 %vm424_vm1, %v5866_v22 }
  0xfe   : > { %v5281_v23 = vpop.f32.mrb[8].mxu1  ;;  %5553 = vmatprep.mubr.msk.bf16.mxu0 %vm424_vm1, %v5869_v24  ;;  %5568 = vmatpush3.bf16.msra.mxu0 %v6066_v4 }
  0xff   : > { %v614_v25 = vmax.f32 %v6419_v7, %v5281_v23  ;;  %v581_v26 = vpop.f32.mrb[9].mxu1  ;;  %v850_v7 = vsub.s32 0, %v6488_v51 }
 0x100   : > { %v612_v28 = vmax.f32 %v6422_v9, %v581_v26  ;;  %v5282_v29 = vpop.f32.mrb[10].mxu1 }
 0x101   : > { %v615_v31 = vmax.f32 %v6425_v11, %v5282_v29  ;;  %v584_v32 = vpop.f32.mrb[11].mxu1 }
 0x102   : > { %v613_v33 = vmax.f32 %v6428_v13, %v584_v32  ;;  %v5878_v13 = vld [vmem:[%s6087_s17 + $0x2f8] sm:$0xff]  }
 0x103   : > { %5540 = vmatmul.mubr.msk.bf16.vlgmr.msra.gmra.mrb[116].mxu1 %vm424_vm1, %v5864_v27  ;;  %v5266_v40 = vpop.f32.mrb[0].mxu0 }
 0x104   : > { %5558 = vmatpush3.bf16.msra.mxu1 %v6066_v4  ;;  %5543 = vmatprep.mubr.msk.bf16.mxu1 %vm424_vm1, %v5867_v30  ;;  %v6478_v44 = vpop.f32.mrb[1].mxu0 }
 0x105   : > { %5712 = vmatprep.subr.msk.bf16.mxu1 %vm437_vm0, %v6358_v2  ;;  %5554 = vmatmul.mubr.msk.bf16.gmra.mrb[108].mxu0 %vm424_vm1, %v5870_v34  ;;  %v392_v2 = vmul.f32 %v6478_v44, %v6478_v44  ;;  %v851_v12 = vrot.slane %v6478_v44, %v850_v7 }
 0x106   : > { %v5285_v35 = vpop.f32.mrb[12].mxu1  ;;  %5569 = vmatprep.mubr.msk.bf16.mxu0 %vm424_vm1, %v5873_v36  ;;  %v6531_v36 = vld [vmem:[%s7015_s4] sm:$0xff] }
 0x107   : > { %v618_v37 = vmax.f32 %v6441_v15, %v5285_v35  ;;  %v597_v38 = vpop.f32.mrb[13].mxu1  ;;  %v393_v48 = vsub.f32 %v5266_v40, %v392_v2  ;;  %v5291_v50 = vpop.f32.mrb[4].mxu0 }
 0x108   : > { %v616_v41 = vmax.f32 %v6444_v17, %v597_v38  ;;  %v5286_v42 = vpop.f32.mrb[14].mxu1  ;;  %v728_v52 = vmax.f32 %v614_v25, %v5291_v50  ;;  %v695_v53 = vpop.f32.mrb[5].mxu0 }
 0x109   : > { %v619_v46 = vmax.f32 %v6447_v19, %v5286_v42  ;;  %v600_v47 = vpop.f32.mrb[15].mxu1  ;;  %v394_v55 = vadd.f32 1e-05, %v393_v48  ;;  %v726_v56 = vmax.f32 %v612_v28, %v695_v53  ;;  %v5292_v57 = vpop.f32.mrb[6].mxu0  ;;  %v5876_v19 = vld [vmem:[%s6087_s17 + $0x1f8] sm:$0xff]  }
 0x10a   : > { %v617_v49 = vmax.f32 %v6450_v21, %v600_v47  ;;  %v729_v60 = vmax.f32 %v615_v31, %v5292_v57  ;;  %v698_v61 = vpop.f32.mrb[7].mxu0 }
 0x10b   : > { %5544 = vmatmul.mubr.msk.bf16.gmra.mrb[120].mxu1 %vm424_vm1, %v5868_v39  ;;  %5883 = vrsqrt.f32 %v394_v55  ;;  %v727_v1 = vmax.f32 %v613_v33, %v698_v61  ;;  %v6549_v55 = vld [vmem:[%s7015_s4 + $0x10] sm:$0xff] }
 0x10c   : > { %5559 = vmatprep.mubr.msk.bf16.mxu1 %vm424_vm1, %v5871_v43  ;;  %v5880_v43 = vld [vmem:[%s6087_s17 + $0x3e8] sm:$0xff]  }
 0x10d   : > { %5570 = vmatmul.mubr.msk.bf16.vlgmr.msra.gmra.mrb[112].mxu0 %vm424_vm1, %v5874_v54 }
 0x10e   : > { %v5295_v58 = vpop.f32.mrb[16].mxu1  ;;  %5573 = vmatprep.mubr.msk.bf16.mxu0 %vm424_vm1, %v5877_v59 }
 0x10f   : > { %v6492_v62 = vmax.f32 %v618_v37, %v5295_v58  ;;  %v711_v63 = vpop.f32.mrb[17].mxu1 }
 0x110   : > { %v730_v3 = vmax.f32 %v616_v41, %v711_v63  ;;  %v5296_v5 = vpop.f32.mrb[18].mxu1  ;;  %v6506_v11 = vpop.f32.mrb[8].mxu0 }
 0x111   : > { %v6497_v8 = vmax.f32 %v619_v46, %v5296_v5  ;;  %v714_v9 = vpop.f32.mrb[19].mxu1  ;;  %v6510_v14 = vpop.f32.mrb[9].mxu0  ;;  %v6541_v46 = vld [vmem:[%s7015_s4 + $0x8] sm:$0xff] }
 0x112   : > { %v6500_v10 = vmax.f32 %v617_v49, %v714_v9  ;;  %v6512_v16 = vpop.f32.mrb[10].mxu0  ;;  %v5881_v49 = vld [vmem:[%s6087_s17 + $0x3f0] sm:$0xff]  }
 0x113   : > { %5560 = vmatmul.mubr.msk.bf16.vlgmr.msra.gmra.mrb[124].mxu1 %vm424_vm1, %v5872_v0  ;;  %v6515_v20 = vpop.f32.mrb[11].mxu0 }
 0x114   : > { %5578 = vmatpush3.bf16.msra.mxu1 %v6066_v4  ;;  %5563 = vmatprep.mubr.msk.bf16.mxu1 %vm424_vm1, %v5875_v6  ;;  %v5879_v4 = vld [vmem:[%s6087_s17 + $0x3e0] sm:$0xff]  }
 0x115   : > { %5574 = vmatmul.mubr.msk.bf16.gmra.mrb[116].mxu0 %vm424_vm1, %v5878_v13  ;;  %v6519_v26 = vpop.eup %5883 }
 0x116   : > { %v5301_v15 = vpop.f32.mrb[20].mxu1  ;;  %v863_v29 = vrot.slane %v6519_v26, %v850_v7 }
 0x117   : > { %v842_v17 = vmax.f32 %v728_v52, %v5301_v15  ;;  %v809_v18 = vpop.f32.mrb[21].mxu1 }
 0x118   : > { %v840_v21 = vmax.f32 %v726_v56, %v809_v18  ;;  %v5302_v22 = vpop.f32.mrb[22].mxu1  ;;  %v6524_v30 = vpop.f32.mrb[12].mxu0 }
 0x119   : > { %v854_v23 = vsub.f32 %v842_v17, %v851_v12  ;;  %v843_v24 = vmax.f32 %v729_v60, %v5302_v22  ;;  %v812_v25 = vpop.f32.mrb[23].mxu1  ;;  %v6526_v35 = vpop.f32.mrb[13].mxu0 }
 0x11a   : > { %v852_v27 = vsub.f32 %v840_v21, %v851_v12  ;;  %v841_v28 = vmax.f32 %v727_v1, %v812_v25  ;;  %v6533_v38 = vpop.f32.mrb[14].mxu0  ;;  %v6571_v21 = vld [vmem:[%s7015_s4 + $0x28] sm:$0xff] }
 0x11b   : > { %5564 = vmatmul.mubr.msk.bf16.gmra.mrb[128].mxu1 %vm424_vm1, %v5876_v19  ;;  %v866_v31 = vmul.f32 %v863_v29, %v854_v23  ;;  %v855_v33 = vsub.f32 %v843_v24, %v851_v12  ;;  %v6536_v45 = vpop.f32.mrb[15].mxu0  ;;  %v5882_v24 = vld [vmem:[%s6087_s17 + $0x3f8] sm:$0xff]   ;;  %s4503_s17 = sshll.u32 %s286_s18, 4  ;;  %s6971_s17 = int_to_ptr.vmem [resolvable:$true] %s4503_s17 }
 0x11c   : > { %5579 = vmatprep.mubr.msk.bf16.mxu1 %vm424_vm1, %v5879_v4  ;;  %v864_v32 = vmul.f32 %v863_v29, %v852_v27  ;;  %v853_v34 = vsub.f32 %v841_v28, %v851_v12  ;;  %s5894_s29 = scalar_lea.vmem %s6971_s17, 128  ;;  %p5901_p0 = scmp.lt.s32.totalorder %s6971_s17, %s5899_s8 }
 0x11d   : > { %v867_v40 = vmul.f32 %v863_v29, %v855_v33  ;;  %v874_v50 = vmax.f32 %v866_v31, 0.0  ;;  %p5895_p11 = scmp.ne.s32.totalorder %s6971_s17, %s5894_s29  ;;  %p5902_p1 = scmp.lt.s32.totalorder %s5900_s9, %s5894_s29 }
 0x11e   : > { %v5305_v37 = vpop.f32.mrb[24].mxu1  ;;  %v872_v39 = vmax.f32 %v864_v32, 0.0  ;;  %v865_v41 = vmul.f32 %v863_v29, %v853_v34 }
 0x11f   : > { %v825_v42 = vpop.f32.mrb[25].mxu1  ;;  %v846_v47 = vmax.f32 %v6492_v62, %v5305_v37  ;;  %v875_v60 = vmax.f32 %v867_v40, 0.0  ;;  %v6558_v62 = vld [vmem:[%s7015_s4 + $0x18] sm:$0xff]  ;;  %v890_v6 = vmul.f32 %v6549_v55, %v874_v50  ;;  %p5896_p12 = pnand %p5895_p11, %p6040_p5  ;;  %p5903_p2 = por %p5902_p1, %p5901_p0 }
 0x120   : > { %v844_v2 = vmax.f32 %v730_v3, %v825_v42  ;;  %v5306_v48 = vpop.f32.mrb[26].mxu1  ;;  %v888_v52 = vmul.f32 %v6531_v36, %v872_v39  ;;  %v873_v53 = vmax.f32 %v865_v41, 0.0  ;;  %v5331_v5 = vpop.f32.mrb[16].mxu0  ;;  %v6581_v39 = vld [vmem:[%s7015_s4 + $0x30] sm:$0xff] }
 0x121   : > { %v828_v54 = vpop.f32.mrb[27].mxu1  ;;  %v858_v56 = vsub.f32 %v846_v47, %v851_v12  ;;  %v847_v58 = vmax.f32 %v6497_v8, %v5306_v48  ;;  %v6565_v8 = vld [vmem:[%s7015_s4 + $0x20] sm:$0xff]  ;;  %v1201_v9 = vpop.f32.mrb[17].mxu0  ;;  %p5897_p13 = pneg %p5896_p12 }
 0x122   : > { %v856_v57 = vsub.f32 %v844_v2, %v851_v12  ;;  %v845_v59 = vmax.f32 %v6500_v10, %v828_v54  ;;  %v889_v61 = vmul.f32 %v6541_v46, %v873_v53  ;;  %v5332_v18 = vpop.f32.mrb[18].mxu0 }
 0x123   : > { %5580 = vmatmul.mubr.msk.bf16.vlgmr.msra.gmra.mrb[132].mxu1 %vm424_vm1, %v5880_v43  ;;  %v870_v63 = vmul.f32 %v863_v29, %v858_v56  ;;  %v859_v1 = vsub.f32 %v847_v58, %v851_v12  ;;  %v1204_v23 = vpop.f32.mrb[19].mxu0  ;;  %p5904_p3 = pnand %p5903_p2, %p5897_p13 }
 0x124   : > { %v868_v0 = vmul.f32 %v863_v29, %v856_v57  ;;  %v857_v3 = vsub.f32 %v845_v59, %v851_v12  ;;  %5583 = vmatprep.mubr.msk.bf16.mxu1 %vm424_vm1, %v5881_v49  ;;  %v896_v7 = vadd.f32 %v889_v61, %v888_v52  ;;  %v891_v12 = vmul.f32 %v6558_v62, %v875_v60 }
 0x125   : > { %v871_v13 = vmul.f32 %v863_v29, %v859_v1  ;;  %v878_v25 = vmax.f32 %v870_v63, 0.0 }
 0x126   : > { %v876_v10 = vmax.f32 %v868_v0, 0.0  ;;  %v869_v15 = vmul.f32 %v863_v29, %v857_v3  ;;  %v5321_v17 = vpop.f32.mrb[28].mxu1  ;;  %v897_v19 = vadd.f32 %v896_v7, %v890_v6  ;;  %v1355_v6 = vsub.s32 1, %v6488_v51 }
 0x127   : > { %v1121_v22 = vmax.f32 %v6506_v11, %v5321_v17  ;;  %v1088_v4 = vpop.f32.mrb[29].mxu1  ;;  %v879_v42 = vmax.f32 %v871_v13, 0.0  ;;  %v894_v48 = vmul.f32 %v6581_v39, %v878_v25 }
 0x128   : > { %v892_v27 = vmul.f32 %v6565_v8, %v876_v10  ;;  %v877_v28 = vmax.f32 %v869_v15, 0.0  ;;  %v5322_v29 = vpop.f32.mrb[30].mxu1  ;;  %v898_v31 = vadd.f32 %v897_v19, %v891_v12  ;;  %v1119_v32 = vmax.f32 %v6510_v14, %v1088_v4  ;;  %v6589_v14 = vld [vmem:[%s7015_s4 + $0x38] sm:$0xff]  ;;  %v5335_v2 = vpop.f32.mrb[20].mxu0 }
 0x129   : > { %v1122_v33 = vmax.f32 %v6512_v16, %v5322_v29  ;;  %v1234_v34 = vmax.f32 %v1121_v22, %v5331_v5  ;;  %v1091_v37 = vpop.f32.mrb[31].mxu1  ;;  %v1217_v50 = vpop.f32.mrb[21].mxu0  ;;  %v1356_v15 = vrot.slane %v6478_v44, %v1355_v6  ;;  %v1368_v19 = vrot.slane %v6519_v26, %v1355_v6 }
 0x12a   : > { %v893_v11 = vmul.f32 %v6571_v21, %v877_v28  ;;  %v1120_v40 = vmax.f32 %v6515_v20, %v1091_v37  ;;  %v899_v41 = vadd.f32 %v898_v31, %v892_v27  ;;  %v1232_v43 = vmax.f32 %v1119_v32, %v1201_v9  ;;  %v5336_v53 = vpop.f32.mrb[22].mxu0 }
 0x12b   : > { %v1235_v47 = vmax.f32 %v1122_v33, %v5332_v18  ;;  %5584 = vmatmul.mubr.msk.bf16.gmra.mrb[136].mxu1 %vm424_vm1, %v5882_v24  ;;  %v895_v20 = vmul.f32 %v6589_v14, %v879_v42  ;;  %v1220_v58 = vpop.f32.mrb[23].mxu0 }
 0x12c   : > { %v1233_v16 = vmax.f32 %v1120_v40, %v1204_v23  ;;  %v900_v49 = vadd.f32 %v899_v41, %v893_v11 }
 0x12e   : > { %v5325_v52 = vpop.f32.mrb[32].mxu1  ;;  %v901_v54 = vadd.f32 %v900_v49, %v894_v48 }
 0x12f   : > { %v1125_v56 = vmax.f32 %v6524_v30, %v5325_v52  ;;  %v1104_v57 = vpop.f32.mrb[33].mxu1 }
 0x130   : > { %v1123_v59 = vmax.f32 %v6526_v35, %v1104_v57  ;;  %v5326_v60 = vpop.f32.mrb[34].mxu1  ;;  %v6595_v61 = vadd.f32 %v901_v54, %v895_v20  ;;  %v6600_v10 = vpop.f32.mrb[24].mxu0 }
 0x131   : > { %v1126_v63 = vmax.f32 %v6533_v38, %v5326_v60  ;;  %v1238_v0 = vmax.f32 %v1125_v56, %v5335_v2  ;;  %v1107_v1 = vpop.f32.mrb[35].mxu1  ;;  %v6602_v30 = vpop.f32.mrb[25].mxu0 }
 0x132   : > { %v1124_v3 = vmax.f32 %v6536_v45, %v1107_v1  ;;  %v1236_v5 = vmax.f32 %v1123_v59, %v1217_v50  ;;  %v6604_v35 = vpop.f32.mrb[26].mxu0 }
 0x133   : > { %v1239_v7 = vmax.f32 %v1126_v63, %v5336_v53  ;;  %v6607_v18 = vpop.f32.mrb[27].mxu0 }
 0x134   : > { %v1237_v9 = vmax.f32 %v1124_v3, %v1220_v58 }
 0x136   : > { %v5341_v13 = vpop.f32.mrb[36].mxu1 }
 0x137   : > { %v1347_v17 = vmax.f32 %v1234_v34, %v5341_v13  ;;  %v1314_v38 = vpop.f32.mrb[37].mxu1 }
 0x138   : > { %v1345_v12 = vmax.f32 %v1232_v43, %v1314_v38  ;;  %v5342_v45 = vpop.f32.mrb[38].mxu1  ;;  %v6610_v32 = vpop.f32.mrb[28].mxu0 }
 0x139   : > { %v1359_v22 = vsub.f32 %v1347_v17, %v1356_v15  ;;  %v1348_v4 = vmax.f32 %v1235_v47, %v5342_v45  ;;  %v1317_v23 = vpop.f32.mrb[39].mxu1  ;;  %v6612_v34 = vpop.f32.mrb[29].mxu0 }
 0x13a   : > { %v1357_v24 = vsub.f32 %v1345_v12, %v1356_v15  ;;  %v1346_v25 = vmax.f32 %v1233_v16, %v1317_v23  ;;  %v6614_v41 = vpop.f32.mrb[30].mxu0 }
 0x13b   : > { %v1371_v27 = vmul.f32 %v1368_v19, %v1359_v22  ;;  %v1360_v28 = vsub.f32 %v1348_v4, %v1356_v15  ;;  %v6616_v47 = vpop.f32.mrb[31].mxu0  ;;  %v903_v4 = vrot.slane %v6595_v61, 4 }
 0x13c   : > { %v1369_v29 = vmul.f32 %v1368_v19, %v1357_v24  ;;  %v1358_v31 = vsub.f32 %v1346_v25, %v1356_v15 }
 0x13d   : > { %v1372_v33 = vmul.f32 %v1368_v19, %v1360_v28  ;;  %v1379_v2 = vmax.f32 %v1371_v27, 0.0 }
 0x13e   : > { %v1377_v37 = vmax.f32 %v1369_v29, 0.0  ;;  %v1370_v11 = vmul.f32 %v1368_v19, %v1358_v31  ;;  %v5345_v40 = vpop.f32.mrb[40].mxu1 }
 0x13f   : > { %v1351_v42 = vmax.f32 %v1238_v0, %v5345_v40  ;;  %v1330_v43 = vpop.f32.mrb[41].mxu1  ;;  %v1380_v50 = vmax.f32 %v1372_v33, 0.0  ;;  %v1387_v63 = vmul.f32 %v1379_v2, %v6549_v55 }
 0x140   : > { %v1378_v16 = vmax.f32 %v1370_v11, 0.0  ;;  %v1349_v48 = vmax.f32 %v1236_v5, %v1330_v43  ;;  %v5346_v49 = vpop.f32.mrb[42].mxu1  ;;  %v1385_v54 = vmul.f32 %v1377_v37, %v6531_v36  ;;  %v5371_v6 = vpop.f32.mrb[32].mxu0 }
 0x141   : > { %v1363_v52 = vsub.f32 %v1351_v42, %v1356_v15  ;;  %v1352_v53 = vmax.f32 %v1239_v7, %v5346_v49  ;;  %v1333_v20 = vpop.f32.mrb[43].mxu1  ;;  %v1698_v13 = vpop.f32.mrb[33].mxu0  ;;  %v1388_v17 = vmul.f32 %v1380_v50, %v6558_v62 }
 0x142   : > { %v1386_v56 = vmul.f32 %v1378_v16, %v6541_v46  ;;  %v1361_v57 = vsub.f32 %v1349_v48, %v1356_v15  ;;  %v1350_v58 = vmax.f32 %v1237_v9, %v1333_v20  ;;  %v5372_v22 = vpop.f32.mrb[34].mxu0  ;;  %v904_v16 = vadd.f32 %v903_v4, %v6595_v61 }
 0x143   : > { %v1375_v59 = vmul.f32 %v1368_v19, %v1363_v52  ;;  %v1364_v60 = vsub.f32 %v1352_v53, %v1356_v15  ;;  %v1701_v25 = vpop.f32.mrb[35].mxu0 }
 0x144   : > { %v1393_v0 = vadd.f32 %v1386_v56, %v1385_v54  ;;  %v1373_v1 = vmul.f32 %v1368_v19, %v1361_v57  ;;  %v1362_v3 = vsub.f32 %v1350_v58, %v1356_v15 }
 0x145   : > { %v1376_v5 = vmul.f32 %v1368_v19, %v1364_v60  ;;  %v1383_v9 = vmax.f32 %v1375_v59, 0.0 }
 0x146   : > { %v1394_v7 = vadd.f32 %v1393_v0, %v1387_v63  ;;  %v1381_v38 = vmax.f32 %v1373_v1, 0.0  ;;  %v1374_v12 = vmul.f32 %v1368_v19, %v1362_v3  ;;  %v5361_v45 = vpop.f32.mrb[44].mxu1 }
 0x147   : > { %v1618_v23 = vmax.f32 %v6600_v10, %v5361_v45  ;;  %v1585_v24 = vpop.f32.mrb[45].mxu1  ;;  %v1384_v33 = vmax.f32 %v1376_v5, 0.0  ;;  %v1391_v48 = vmul.f32 %v1383_v9, %v6581_v39 }
 0x148   : > { %v1389_v27 = vmul.f32 %v1381_v38, %v6565_v8  ;;  %v1395_v15 = vadd.f32 %v1394_v7, %v1388_v17  ;;  %v1382_v28 = vmax.f32 %v1374_v12, 0.0  ;;  %v1616_v29 = vmax.f32 %v6602_v30, %v1585_v24  ;;  %v5362_v31 = vpop.f32.mrb[46].mxu1  ;;  %v5375_v30 = vpop.f32.mrb[36].mxu0 }
 0x149   : > { %v1619_v37 = vmax.f32 %v6604_v35, %v5362_v31  ;;  %v1731_v19 = vmax.f32 %v1618_v23, %v5371_v6  ;;  %v1588_v11 = vpop.f32.mrb[47].mxu1  ;;  %v1714_v52 = vpop.f32.mrb[37].mxu0  ;;  %v1392_v53 = vmul.f32 %v1384_v33, %v6589_v14 }
 0x14a   : > { %v1396_v40 = vadd.f32 %v1395_v15, %v1389_v27  ;;  %v1390_v42 = vmul.f32 %v1382_v28, %v6571_v21  ;;  %v1617_v43 = vmax.f32 %v6607_v18, %v1588_v11  ;;  %v1729_v10 = vmax.f32 %v1616_v29, %v1698_v13  ;;  %v5376_v54 = vpop.f32.mrb[38].mxu0 }
 0x14b   : > { %v1732_v2 = vmax.f32 %v1619_v37, %v5372_v22  ;;  %v1717_v58 = vpop.f32.mrb[39].mxu0  ;;  %v905_v18 = vrot.slane %v904_v16, 2  ;;  %v1852_v13 = vsub.s32 2, %v6488_v51 }
 0x14c   : > { %v1397_v49 = vadd.f32 %v1396_v40, %v1390_v42  ;;  %v1730_v50 = vmax.f32 %v1617_v43, %v1701_v25 }
 0x14d   : > { %v906_v7 = vadd.f32 %v905_v18, %v904_v16  ;;  %v1865_v28 = vrot.slane %v6519_v26, %v1852_v13 }
 0x14e   : > { %v1398_v35 = vadd.f32 %v1397_v49, %v1391_v48  ;;  %v5365_v20 = vpop.f32.mrb[48].mxu1 }
 0x14f   : > { %v1622_v56 = vmax.f32 %v6610_v32, %v5365_v20  ;;  %v1601_v57 = vpop.f32.mrb[49].mxu1  ;;  %v907_v24 = vrot.slane %v906_v7, 1 }
 0x150   : > { %v1399_v59 = vadd.f32 %v1398_v35, %v1392_v53  ;;  %v1620_v60 = vmax.f32 %v6612_v34, %v1601_v57  ;;  %v5366_v61 = vpop.f32.mrb[50].mxu1  ;;  %v6637_v12 = vpop.f32.mrb[40].mxu0 }
 0x151   : > { %v1623_v63 = vmax.f32 %v6614_v41, %v5366_v61  ;;  %v1735_v0 = vmax.f32 %v1622_v56, %v5375_v30  ;;  %v1604_v1 = vpop.f32.mrb[51].mxu1  ;;  %v6639_v45 = vpop.f32.mrb[41].mxu0  ;;  %v1853_v41 = vrot.slane %v6478_v44, %v1852_v13  ;;  %v908_v16 = vadd.f32 %v907_v24, %v906_v7 }
 0x152   : > { %v1400_v3 = vrot.slane %v1399_v59, 4  ;;  %v1621_v6 = vmax.f32 %v6616_v47, %v1604_v1  ;;  %v1733_v5 = vmax.f32 %v1620_v60, %v1714_v52  ;;  %v6641_v4 = vpop.f32.mrb[42].mxu0 }
 0x153   : > { %v1736_v17 = vmax.f32 %v1623_v63, %v5376_v54  ;;  %v6644_v47 = vpop.f32.mrb[43].mxu0 }
 0x154   : > { %v1401_v32 = vadd.f32 %v1400_v3, %v1399_v59  ;;  %v1734_v38 = vmax.f32 %v1621_v6, %v1717_v58 }
 0x156   : > { %v1402_v34 = vrot.slane %v1401_v32, 2  ;;  %v5381_v22 = vpop.f32.mrb[52].mxu1 }
 0x157   : > { %v1844_v9 = vmax.f32 %v1731_v19, %v5381_v22  ;;  %v1811_v23 = vpop.f32.mrb[53].mxu1 }
 0x158   : > { %v1403_v25 = vadd.f32 %v1402_v34, %v1401_v32  ;;  %v1842_v27 = vmax.f32 %v1729_v10, %v1811_v23  ;;  %v5382_v15 = vpop.f32.mrb[54].mxu1  ;;  %v6647_v30 = vpop.f32.mrb[44].mxu0 }
 0x159   : > { %v1856_v29 = vsub.f32 %v1844_v9, %v1853_v41  ;;  %v1845_v31 = vmax.f32 %v1732_v2, %v5382_v15  ;;  %v1814_v33 = vpop.f32.mrb[55].mxu1  ;;  %v6649_v10 = vpop.f32.mrb[45].mxu0 }
 0x15a   : > { %v1404_v37 = vrot.slane %v1403_v25, 1  ;;  %v1854_v11 = vsub.f32 %v1842_v27, %v1853_v41  ;;  %v1843_v40 = vmax.f32 %v1730_v50, %v1814_v33  ;;  %v6651_v2 = vpop.f32.mrb[46].mxu0 }
 0x15b   : > { %v1868_v42 = vmul.f32 %v1865_v28, %v1856_v29  ;;  %v1857_v43 = vsub.f32 %v1845_v31, %v1853_v41  ;;  %v6655_v57 = vpop.f32.mrb[47].mxu0 }
 0x15c   : > { %v1405_v19 = vadd.f32 %v1404_v37, %v1403_v25  ;;  %v1866_v48 = vmul.f32 %v1865_v28, %v1854_v11  ;;  %v1855_v49 = vsub.f32 %v1843_v40, %v1853_v41 }
 0x15d   : > { %v1869_v52 = vmul.f32 %v1865_v28, %v1857_v43  ;;  %v1876_v58 = vmax.f32 %v1868_v42, 0.0 }
 0x15e   : > { %v1874_v53 = vmax.f32 %v1866_v48, 0.0  ;;  %v1867_v35 = vmul.f32 %v1865_v28, %v1855_v49  ;;  %v5385_v20 = vpop.f32.mrb[56].mxu1  ;;  %v6653_v54 = vsel %vm4388_vm2, %v908_v16, %v1405_v19 }
 0x15f   : > { %v1848_v50 = vmax.f32 %v1735_v0, %v5385_v20  ;;  %v1827_v56 = vpop.f32.mrb[57].mxu1  ;;  %v1877_v61 = vmax.f32 %v1869_v52, 0.0  ;;  %v1884_v0 = vmul.f32 %v1876_v58, %v6549_v55 }
 0x160   : > { %v1875_v18 = vmax.f32 %v1867_v35, 0.0  ;;  %v1846_v59 = vmax.f32 %v1733_v5, %v1827_v56  ;;  %v5386_v60 = vpop.f32.mrb[58].mxu1  ;;  %v1882_v6 = vmul.f32 %v1874_v53, %v6531_v36  ;;  %v5411_v25 = vpop.f32.mrb[48].mxu0 }
 0x161   : > { %v1860_v63 = vsub.f32 %v1848_v50, %v1853_v41  ;;  %v1849_v1 = vmax.f32 %v1736_v17, %v5386_v60  ;;  %v1830_v3 = vpop.f32.mrb[59].mxu1  ;;  %v2195_v27 = vpop.f32.mrb[49].mxu0  ;;  %v1885_v15 = vmul.f32 %v1877_v61, %v6558_v62 }
 0x162   : > { %v1883_v13 = vmul.f32 %v1875_v18, %v6541_v46  ;;  %v1858_v7 = vsub.f32 %v1846_v59, %v1853_v41  ;;  %v1847_v32 = vmax.f32 %v1734_v38, %v1830_v3  ;;  %v5412_v37 = vpop.f32.mrb[50].mxu0 }
 0x163   : > { %v1872_v34 = vmul.f32 %v1865_v28, %v1860_v63  ;;  %v1861_v22 = vsub.f32 %v1849_v1, %v1853_v41  ;;  %v2198_v42 = vpop.f32.mrb[51].mxu0 }
 0x164   : > { %v1890_v9 = vadd.f32 %v1883_v13, %v1882_v6  ;;  %v1870_v23 = vmul.f32 %v1865_v28, %v1858_v7  ;;  %v1859_v24 = vsub.f32 %v1847_v32, %v1853_v41 }
 0x165   : > { %v1873_v5 = vmul.f32 %v1865_v28, %v1861_v22  ;;  %v1880_v11 = vmax.f32 %v1872_v34, 0.0 }
 0x166   : > { %v1891_v17 = vadd.f32 %v1890_v9, %v1884_v0  ;;  %v1878_v29 = vmax.f32 %v1870_v23, 0.0  ;;  %v1871_v31 = vmul.f32 %v1865_v28, %v1859_v24  ;;  %v5401_v33 = vpop.f32.mrb[60].mxu1 }
 0x167   : > { %v2115_v38 = vmax.f32 %v6637_v12, %v5401_v33  ;;  %v2082_v40 = vpop.f32.mrb[61].mxu1  ;;  %v1881_v49 = vmax.f32 %v1873_v5, 0.0  ;;  %v1888_v58 = vmul.f32 %v1880_v11, %v6581_v39 }
 0x168   : > { %v1886_v43 = vmul.f32 %v1878_v29, %v6565_v8  ;;  %v1892_v16 = vadd.f32 %v1891_v17, %v1885_v15  ;;  %v1879_v19 = vmax.f32 %v1871_v31, 0.0  ;;  %v2113_v41 = vmax.f32 %v6639_v45, %v2082_v40  ;;  %v5402_v48 = vpop.f32.mrb[62].mxu1  ;;  %v5415_v60 = vpop.f32.mrb[52].mxu0 }
 0x169   : > { %v2116_v52 = vmax.f32 %v6641_v4, %v5402_v48  ;;  %v2228_v53 = vmax.f32 %v2115_v38, %v5411_v25  ;;  %v2085_v35 = vpop.f32.mrb[63].mxu1  ;;  %v2211_v61 = vpop.f32.mrb[53].mxu0  ;;  %v1889_v45 = vmul.f32 %v1881_v49, %v6589_v14  ;;  %v2349_v25 = vsub.s32 3, %v6488_v51 }
 0x16a   : > { %v1893_v28 = vadd.f32 %v1892_v16, %v1886_v43  ;;  %v1887_v20 = vmul.f32 %v1879_v19, %v6571_v21  ;;  %v2114_v50 = vmax.f32 %v6644_v47, %v2085_v35  ;;  %v2226_v12 = vmax.f32 %v2113_v41, %v2195_v27  ;;  %v5416_v4 = vpop.f32.mrb[54].mxu0 }
 0x16b   : > { %v2229_v56 = vmax.f32 %v2116_v52, %v5412_v37  ;;  %v2214_v13 = vpop.f32.mrb[55].mxu0 }
 0x16c   : > { %v1894_v18 = vadd.f32 %v1893_v28, %v1887_v20  ;;  %v2227_v59 = vmax.f32 %v2114_v50, %v2198_v42  ;;  %v2362_v42 = vrot.slane %v6519_v26, %v2349_v25 }
 0x16e   : > { %v1895_v63 = vadd.f32 %v1894_v18, %v1888_v58  ;;  %v5405_v1 = vpop.f32.mrb[64].mxu1 }
 0x16f   : > { %v2119_v3 = vmax.f32 %v6647_v30, %v5405_v1  ;;  %v2098_v6 = vpop.f32.mrb[65].mxu1 }
 0x170   : > { %v1896_v7 = vadd.f32 %v1895_v63, %v1889_v45  ;;  %v2117_v47 = vmax.f32 %v6649_v10, %v2098_v6  ;;  %v5406_v32 = vpop.f32.mrb[66].mxu1  ;;  %v6676_v30 = vpop.f32.mrb[56].mxu0  ;;  %v4402_v6 = vld [vmem:[%s7016_s5 + $0x8] sm:$0xff] }
 0x171   : > { %v2120_v34 = vmax.f32 %v6651_v2, %v5406_v32  ;;  %v2232_v22 = vmax.f32 %v2119_v3, %v5415_v60  ;;  %v2101_v0 = vpop.f32.mrb[67].mxu1  ;;  %v6678_v17 = vpop.f32.mrb[57].mxu0  ;;  %v2350_v2 = vrot.slane %v6478_v44, %v2349_v25  ;;  %v4401_v3 = vld [vmem:[%s7016_s5] sm:$0xff] }
 0x172   : > { %v1897_v9 = vrot.slane %v1896_v7, 4  ;;  %v2118_v23 = vmax.f32 %v6655_v57, %v2101_v0  ;;  %v2230_v24 = vmax.f32 %v2117_v47, %v2211_v61  ;;  %v6680_v31 = vpop.f32.mrb[58].mxu0 }
 0x173   : > { %v2233_v5 = vmax.f32 %v2120_v34, %v5416_v4  ;;  %v6683_v57 = vpop.f32.mrb[59].mxu0 }
 0x174   : > { %v1898_v27 = vadd.f32 %v1897_v9, %v1896_v7  ;;  %v6674_v15 = vmax.f32 %v2118_v23, %v2214_v13  ;;  %v5958_v9 = vmov 0.0|0.0  }
 0x175   : > { %5654 = vmatprep.subr.bf16.mxu0 %v5958_v9 }
 0x176   : > { %v1899_v10 = vrot.slane %v1898_v27, 2  ;;  %v5421_v29 = vpop.f32.mrb[68].mxu1 }
 0x177   : > { %v2341_v33 = vmax.f32 %v2228_v53, %v5421_v29  ;;  %v2308_v37 = vpop.f32.mrb[69].mxu1 }
 0x178   : > { %v1900_v11 = vadd.f32 %v1899_v10, %v1898_v27  ;;  %v2339_v38 = vmax.f32 %v2226_v12, %v2308_v37  ;;  %v5422_v40 = vpop.f32.mrb[70].mxu1  ;;  %v6686_v50 = vpop.f32.mrb[60].mxu0  ;;  %v4404_v37 = vld [vmem:[%s7016_s5 + $0x18] sm:$0xff] }
 0x179   : > { %v2353_v43 = vsub.f32 %v2341_v33, %v2350_v2  ;;  %v2342_v16 = vmax.f32 %v2229_v56, %v5422_v40  ;;  %v2311_v19 = vpop.f32.mrb[71].mxu1  ;;  %v6688_v18 = vpop.f32.mrb[61].mxu0 }
 0x17a   : > { %v1901_v41 = vrot.slane %v1900_v11, 1  ;;  %v2351_v48 = vsub.f32 %v2339_v38, %v2350_v2  ;;  %v2340_v49 = vmax.f32 %v2227_v59, %v2311_v19  ;;  %v6690_v45 = vpop.f32.mrb[62].mxu0 }
 0x17b   : > { %v2365_v52 = vmul.f32 %v2362_v42, %v2353_v43  ;;  %v2354_v35 = vsub.f32 %v2342_v16, %v2350_v2  ;;  %v6695_v4 = vpop.f32.mrb[63].mxu0 }
 0x17c   : > { %v1902_v28 = vadd.f32 %v1901_v41, %v1900_v11  ;;  %v2363_v20 = vmul.f32 %v2362_v42, %v2351_v48  ;;  %v2352_v53 = vsub.f32 %v2340_v49, %v2350_v2 }
 0x17d   : > { %v2366_v58 = vmul.f32 %v2362_v42, %v2354_v35  ;;  %v2373_v59 = vmax.f32 %v2365_v52, 0.0 }
 0x17e   : > { %v2371_v12 = vmax.f32 %v2363_v20, 0.0  ;;  %v2364_v60 = vmul.f32 %v2362_v42, %v2352_v53  ;;  %v5425_v61 = vpop.f32.mrb[72].mxu1  ;;  %v6693_v56 = vsel %vm4390_vm3, %v6653_v54, %v1902_v28 }
 0x17f   : > { %v2345_v63 = vmax.f32 %v2232_v22, %v5425_v61  ;;  %v2324_v1 = vpop.f32.mrb[73].mxu1  ;;  %v2374_v32 = vmax.f32 %v2366_v58, 0.0  ;;  %v5655_v22 = vpack.c.bf16 %v4402_v6, %v4401_v3  ;;  %v2381_v29 = vmul.f32 %v2373_v59, %v6549_v55 }
 0x180   : > { %v2372_v13 = vmax.f32 %v2364_v60, 0.0  ;;  %v2343_v7 = vmax.f32 %v2230_v24, %v2324_v1  ;;  %v5426_v47 = vpop.f32.mrb[74].mxu1  ;;  %v2379_v23 = vmul.f32 %v2371_v12, %v6531_v36  ;;  %v5451_v43 = vpop.f32.mrb[64].mxu0  ;;  %v4406_v60 = vld [vmem:[%s7016_s5 + $0x28] sm:$0xff] }
 0x181   : > { %v2357_v34 = vsub.f32 %v2345_v63, %v2350_v2  ;;  %v2346_v54 = vmax.f32 %v2233_v5, %v5426_v47  ;;  %v2327_v0 = vpop.f32.mrb[75].mxu1  ;;  %5656 = vmatpush3.bf16.msra.mxu0 %v5655_v22  ;;  %v4403_v5 = vld [vmem:[%s7016_s5 + $0x10] sm:$0xff]  ;;  %v2692_v19 = vpop.f32.mrb[65].mxu0  ;;  %v2382_v41 = vmul.f32 %v2374_v32, %v6558_v62 }
 0x182   : > { %v2380_v25 = vmul.f32 %v2372_v13, %v6541_v46  ;;  %v2355_v27 = vsub.f32 %v2343_v7, %v2350_v2  ;;  %v2344_v10 = vmax.f32 %v6674_v15, %v2327_v0  ;;  %5657 = vmatprep.subr.bf16.mxu0 %v5958_v9  ;;  %v5658_v15 = vpack.c.bf16 %v4404_v37, %v4403_v5  ;;  %v5452_v28 = vpop.f32.mrb[66].mxu0 }
 0x183   : > { %v2369_v33 = vmul.f32 %v2362_v42, %v2357_v34  ;;  %v2358_v24 = vsub.f32 %v2346_v54, %v2350_v2  ;;  %v2695_v12 = vpop.f32.mrb[67].mxu0 }
 0x184   : > { %v2387_v11 = vadd.f32 %v2380_v25, %v2379_v23  ;;  %v2367_v38 = vmul.f32 %v2362_v42, %v2355_v27  ;;  %v2356_v40 = vsub.f32 %v2344_v10, %v2350_v2  ;;  %v4405_v2 = vld [vmem:[%s7016_s5 + $0x20] sm:$0xff] }
 0x185   : > { %v2370_v16 = vmul.f32 %v2362_v42, %v2358_v24  ;;  %v2377_v20 = vmax.f32 %v2369_v33, 0.0  ;;  %5659 = vmatpush3.bf16.msra.mxu0 %v5658_v15  ;;  %v5661_v7 = vpack.c.bf16 %v4406_v60, %v4405_v2  ;;  %v4413_v60 = vld [vmem:[%s7016_s5 + $0x60] sm:$0xff] }
 0x186   : > { %v2388_v48 = vadd.f32 %v2387_v11, %v2381_v29  ;;  %v2375_v49 = vmax.f32 %v2367_v38, 0.0  ;;  %v2368_v52 = vmul.f32 %v2362_v42, %v2356_v40  ;;  %v5441_v35 = vpop.f32.mrb[76].mxu1  ;;  %5660 = vmatprep.subr.bf16.mxu0 %v5958_v9  ;;  %v4409_v40 = vld [vmem:[%s7016_s5 + $0x40] sm:$0xff] }
 0x187   : > { %v2612_v53 = vmax.f32 %v6676_v30, %v5441_v35  ;;  %v2579_v58 = vpop.f32.mrb[77].mxu1  ;;  %v2378_v30 = vmax.f32 %v2370_v16, 0.0  ;;  %v2385_v22 = vmul.f32 %v2377_v20, %v6581_v39  ;;  %v4411_v20 = vld [vmem:[%s7016_s5 + $0x50] sm:$0xff] }
 0x188   : > { %v2383_v61 = vmul.f32 %v2375_v49, %v6565_v8  ;;  %v2389_v59 = vadd.f32 %v2388_v48, %v2382_v41  ;;  %v2376_v42 = vmax.f32 %v2368_v52, 0.0  ;;  %v2610_v63 = vmax.f32 %v6678_v17, %v2579_v58  ;;  %v5442_v1 = vpop.f32.mrb[78].mxu1  ;;  %v4407_v17 = vld [vmem:[%s7016_s5 + $0x30] sm:$0xff]  ;;  %v5455_v27 = vpop.f32.mrb[68].mxu0 }
 0x189   : > { %v2613_v3 = vmax.f32 %v6680_v31, %v5442_v1  ;;  %v6727_v6 = vmax.f32 %v2612_v53, %v5451_v43  ;;  %v2582_v13 = vpop.f32.mrb[79].mxu1  ;;  %5662 = vmatpush3.bf16.msra.mxu0 %v5661_v7  ;;  %v4408_v31 = vld [vmem:[%s7016_s5 + $0x38] sm:$0xff]  ;;  %v2708_v10 = vpop.f32.mrb[69].mxu0  ;;  %v2386_v29 = vmul.f32 %v2378_v30, %v6589_v14  ;;  %v4410_v43 = vld [vmem:[%s7016_s5 + $0x48] sm:$0xff]  ;;  %v2846_v53 = vsub.s32 4, %v6488_v51 }
 0x18a   : > { %v2390_v47 = vadd.f32 %v2389_v59, %v2383_v61  ;;  %v2384_v32 = vmul.f32 %v2376_v42, %v6571_v21  ;;  %v2611_v34 = vmax.f32 %v6683_v57, %v2582_v13  ;;  %v6731_v54 = vmax.f32 %v2610_v63, %v2692_v19  ;;  %5663 = vmatprep.subr.bf16.mxu0 %v5958_v9  ;;  %v5456_v5 = vpop.f32.mrb[70].mxu0  ;;  %v4414_v61 = vld [vmem:[%s7016_s5 + $0x68] sm:$0xff] }
 0x18b   : > { %v6733_v0 = vmax.f32 %v2613_v3, %v5452_v28  ;;  %v5664_v57 = vpack.c.bf16 %v4408_v31, %v4407_v17  ;;  %v2711_v38 = vpop.f32.mrb[71].mxu0  ;;  %v5667_v41 = vpack.c.bf16 %v4410_v43, %v4409_v40  ;;  %v5960_v42 = vmov 0.0  }
 0x18c   : > { %v2391_v23 = vadd.f32 %v2390_v47, %v2384_v32  ;;  %v6742_v25 = vmax.f32 %v2611_v34, %v2695_v12  ;;  %5619 = vmatprep.mubr.msk.f32.mxu0 %vm5959_vm4, %v5960_v42  ;;  %v2847_v3 = vrot.slane %v6478_v44, %v2846_v53  ;;  %v5673_v32 = vpack.c.bf16 %v4414_v61, %v4413_v60 }
 0x18d   : > { %5665 = vmatpush3.bf16.msra.mxu0 %v5664_v57 }
 0x18e   : > { %v2392_v33 = vadd.f32 %v2391_v23, %v2385_v22  ;;  %v5445_v24 = vpop.f32.mrb[80].mxu1  ;;  %5666 = vmatprep.subr.bf16.mxu0 %v5958_v9  ;;  %v4415_v22 = vld [vmem:[%s7016_s5 + $0x70] sm:$0xff]  ;;  %v4416_v23 = vld [vmem:[%s7016_s5 + $0x78] sm:$0xff] }
 0x18f   : > { %v2616_v37 = vmax.f32 %v6686_v50, %v5445_v24  ;;  %v2595_v11 = vpop.f32.mrb[81].mxu1 }
 0x190   : > { %v2393_v15 = vadd.f32 %v2392_v33, %v2386_v29  ;;  %v2614_v16 = vmax.f32 %v6688_v18, %v2595_v11  ;;  %v5446_v19 = vpop.f32.mrb[82].mxu1  ;;  %v4412_v18 = vld [vmem:[%s7016_s5 + $0x58] sm:$0xff] }
 0x191   : > { %v2617_v50 = vmax.f32 %v6690_v45, %v5446_v19  ;;  %v6756_v48 = vmax.f32 %v2616_v37, %v5455_v27  ;;  %v2598_v49 = vpop.f32.mrb[83].mxu1  ;;  %5668 = vmatpush3.bf16.msra.mxu0 %v5667_v41  ;;  %v5670_v45 = vpack.c.bf16 %v4412_v18, %v4411_v20  ;;  %v5676_v37 = vpack.c.bf16 %v4416_v23, %v4415_v22 }
 0x192   : > { %v2394_v52 = vrot.slane %v2393_v15, 4  ;;  %v2615_v35 = vmax.f32 %v6695_v4, %v2598_v49  ;;  %v6759_v28 = vmax.f32 %v2614_v16, %v2708_v10  ;;  %v6772_v4 = vpop.f32.mrb[72].mxu0  ;;  %5669 = vmatprep.subr.bf16.mxu0 %v5958_v9 }
 0x193   : > { %v6768_v58 = vmax.f32 %v2617_v50, %v5456_v5  ;;  %v6781_v59 = vpop.f32.mrb[73].mxu0 }
 0x194   : > { %v2395_v12 = vadd.f32 %v2394_v52, %v2393_v15  ;;  %v6770_v2 = vmax.f32 %v2615_v35, %v2711_v38  ;;  %v6783_v30 = vpop.f32.mrb[74].mxu0 }
 0x195   : > { %v6787_v47 = vpop.f32.mrb[75].mxu0  ;;  %5671 = vmatpush3.bf16.msra.mxu0 %v5670_v45 }
 0x196   : > { %v2396_v63 = vrot.slane %v2395_v12, 2  ;;  %v5461_v1 = vpop.f32.mrb[84].mxu1  ;;  %5672 = vmatprep.subr.bf16.mxu0 %v5958_v9 }
 0x197   : > { %v2838_v13 = vmax.f32 %v6727_v6, %v5461_v1  ;;  %v2805_v7 = vpop.f32.mrb[85].mxu1  ;;  %v2859_v6 = vrot.slane %v6519_v26, %v2846_v53 }
 0x198   : > { %v2397_v34 = vadd.f32 %v2396_v63, %v2395_v12  ;;  %v2836_v17 = vmax.f32 %v6731_v54, %v2805_v7  ;;  %v5462_v31 = vpop.f32.mrb[86].mxu1  ;;  %v6800_v43 = vpop.f32.mrb[76].mxu0 }
 0x199   : > { %v2850_v27 = vsub.f32 %v2838_v13, %v2847_v3  ;;  %v2839_v57 = vmax.f32 %v6733_v0, %v5462_v31  ;;  %v2808_v10 = vpop.f32.mrb[87].mxu1  ;;  %5674 = vmatpush3.bf16.msra.mxu0 %v5673_v32  ;;  %v6803_v16 = vpop.f32.mrb[77].mxu0 }
 0x19a   : > { %v2398_v29 = vrot.slane %v2397_v34, 1  ;;  %v2848_v33 = vsub.f32 %v2836_v17, %v2847_v3  ;;  %v2837_v54 = vmax.f32 %v6742_v25, %v2808_v10  ;;  %5675 = vmatprep.subr.bf16.mxu0 %v5958_v9  ;;  %v6805_v50 = vpop.f32.mrb[78].mxu0 }
 0x19b   : > { %v2862_v24 = vmul.f32 %v2859_v6, %v2850_v27  ;;  %v2851_v5 = vsub.f32 %v2839_v57, %v2847_v3  ;;  %v6811_v35 = vpop.f32.mrb[79].mxu0 }
 0x19c   : > { %v2399_v11 = vadd.f32 %v2398_v29, %v2397_v34  ;;  %v2860_v38 = vmul.f32 %v2859_v6, %v2848_v33  ;;  %v2849_v40 = vsub.f32 %v2837_v54, %v2847_v3 }
 0x19d   : > { %v2863_v15 = vmul.f32 %v2859_v6, %v2851_v5  ;;  %5677 = vmatpush3.bf16.msra.mxu0 %v5676_v37  ;;  %v2870_v20 = vmax.f32 %v2862_v24, 0.0 }
 0x19e   : > { %v2868_v0 = vmax.f32 %v2860_v38, 0.0  ;;  %v2861_v19 = vmul.f32 %v2859_v6, %v2849_v40  ;;  %v5465_v41 = vpop.f32.mrb[88].mxu1  ;;  %v6808_v25 = vsel %vm4392_vm5, %v6693_v56, %v2399_v11 }
 0x19f   : > { %v2842_v49 = vmax.f32 %v6756_v48, %v5465_v41  ;;  %v2821_v52 = vpop.f32.mrb[89].mxu1  ;;  %v2871_v45 = vmax.f32 %v2863_v15, 0.0  ;;  %v2878_v7 = vmul.f32 %v2870_v20, %v6549_v55 }
 0x1a0   : > { %v2869_v18 = vmax.f32 %v2861_v19, 0.0  ;;  %v2840_v9 = vmax.f32 %v6759_v28, %v2821_v52  ;;  %v5466_v53 = vpop.f32.mrb[90].mxu1  ;;  %v2876_v42 = vmul.f32 %v2868_v0, %v6531_v36  ;;  %v5491_v17 = vpop.f32.mrb[80].mxu0 }
 0x1a1   : > { %v2854_v12 = vsub.f32 %v2842_v49, %v2847_v3  ;;  %v2843_v60 = vmax.f32 %v6768_v58, %v5466_v53  ;;  %v2824_v61 = vpop.f32.mrb[91].mxu1  ;;  %v3189_v22 = vpop.f32.mrb[81].mxu0  ;;  %v2879_v58 = vmul.f32 %v2871_v45, %v6558_v62 }
 0x1a2   : > { %v2877_v56 = vmul.f32 %v2869_v18, %v6541_v46  ;;  %v2852_v63 = vsub.f32 %v2840_v9, %v2847_v3  ;;  %v2841_v48 = vmax.f32 %v6770_v2, %v2824_v61  ;;  %v5492_v46 = vpop.f32.mrb[82].mxu0 }
 0x1a3   : > { %v2866_v1 = vmul.f32 %v2859_v6, %v2854_v12  ;;  %v2855_v13 = vsub.f32 %v2843_v60, %v2847_v3  ;;  %v3192_v33 = vpop.f32.mrb[83].mxu0 }
 0x1a4   : > { %v2884_v32 = vadd.f32 %v2877_v56, %v2876_v42  ;;  %v2864_v34 = vmul.f32 %v2859_v6, %v2852_v63  ;;  %v2853_v28 = vsub.f32 %v2841_v48, %v2847_v3 }
 0x1a5   : > { %v2867_v31 = vmul.f32 %v2859_v6, %v2855_v13  ;;  %v2874_v10 = vmax.f32 %v2866_v1, 0.0 }
 0x1a6   : > { %v2885_v23 = vadd.f32 %v2884_v32, %v2878_v7  ;;  %v2872_v27 = vmax.f32 %v2864_v34, 0.0  ;;  %v2865_v36 = vmul.f32 %v2859_v6, %v2853_v28  ;;  %v5481_v57 = vpop.f32.mrb[92].mxu1 }
 0x1a7   : > { %v3109_v2 = vmax.f32 %v6772_v4, %v5481_v57  ;;  %v3076_v29 = vpop.f32.mrb[93].mxu1  ;;  %v2875_v37 = vmax.f32 %v2867_v31, 0.0  ;;  %v2882_v19 = vmul.f32 %v2874_v10, %v6581_v39 }
 0x1a8   : > { %v2880_v55 = vmul.f32 %v2872_v27, %v6565_v8  ;;  %v2886_v54 = vadd.f32 %v2885_v23, %v2879_v58  ;;  %v2873_v24 = vmax.f32 %v2865_v36, 0.0  ;;  %v3107_v3 = vmax.f32 %v6781_v59, %v3076_v29  ;;  %v5482_v5 = vpop.f32.mrb[94].mxu1  ;;  %v5495_v49 = vpop.f32.mrb[84].mxu0 }
 0x1a9   : > { %v3110_v62 = vmax.f32 %v6783_v30, %v5482_v5  ;;  %v3222_v11 = vmax.f32 %v3109_v2, %v5491_v17  ;;  %v3079_v38 = vpop.f32.mrb[95].mxu1  ;;  %v3205_v52 = vpop.f32.mrb[85].mxu0  ;;  %v2883_v59 = vmul.f32 %v2875_v37, %v6589_v14  ;;  %v3343_v14 = vsub.s32 5, %v6488_v51 }
 0x1aa   : > { %v2887_v6 = vadd.f32 %v2886_v54, %v2880_v55  ;;  %v2881_v40 = vmul.f32 %v2873_v24, %v6571_v21  ;;  %v3108_v15 = vmax.f32 %v6787_v47, %v3079_v38  ;;  %v3220_v4 = vmax.f32 %v3107_v3, %v3189_v22  ;;  %v5496_v30 = vpop.f32.mrb[86].mxu0 }
 0x1ab   : > { %v3223_v0 = vmax.f32 %v3110_v62, %v5492_v46  ;;  %v3208_v45 = vpop.f32.mrb[87].mxu0  ;;  %v3356_v23 = vrot.slane %v6519_v26, %v3343_v14 }
 0x1ac   : > { %v2888_v8 = vadd.f32 %v2887_v6, %v2881_v40  ;;  %v3221_v41 = vmax.f32 %v3108_v15, %v3192_v33 }
 0x1ae   : > { %v2889_v20 = vadd.f32 %v2888_v8, %v2882_v19  ;;  %v5485_v18 = vpop.f32.mrb[96].mxu1 }
 0x1af   : > { %v3113_v9 = vmax.f32 %v6800_v43, %v5485_v18  ;;  %v3092_v53 = vpop.f32.mrb[97].mxu1 }
 0x1b0   : > { %v2890_v21 = vadd.f32 %v2889_v20, %v2883_v59  ;;  %v3111_v47 = vmax.f32 %v6803_v16, %v3092_v53  ;;  %v5486_v12 = vpop.f32.mrb[98].mxu1  ;;  %v6833_v43 = vpop.f32.mrb[88].mxu0 }
 0x1b1   : > { %v3114_v60 = vmax.f32 %v6805_v50, %v5486_v12  ;;  %v3226_v39 = vmax.f32 %v3113_v9, %v5495_v49  ;;  %v3095_v61 = vpop.f32.mrb[99].mxu1  ;;  %v6835_v7 = vpop.f32.mrb[89].mxu0  ;;  %v3344_v50 = vrot.slane %v6478_v44, %v3343_v14  ;;  %v6864_v9 = vld [vmem:[%s7015_s4 + $0x8] sm:$0xff] }
 0x1b2   : > { %v2891_v42 = vrot.slane %v2890_v21, 4  ;;  %v3112_v56 = vmax.f32 %v6811_v35, %v3095_v61  ;;  %v3224_v63 = vmax.f32 %v3111_v47, %v3205_v52  ;;  %v6837_v34 = vpop.f32.mrb[90].mxu0 }
 0x1b3   : > { %v3227_v48 = vmax.f32 %v3114_v60, %v5496_v30  ;;  %v6840_v31 = vpop.f32.mrb[91].mxu0  ;;  %v6858_v30 = vld [vmem:[%s7015_s4] sm:$0xff]  ;;  %v6870_v60 = vld [vmem:[%s7015_s4 + $0x10] sm:$0xff] }
 0x1b4   : > { %v2892_v1 = vadd.f32 %v2891_v42, %v2890_v21  ;;  %v3225_v13 = vmax.f32 %v3112_v56, %v3208_v45 }
 0x1b6   : > { %v2893_v32 = vrot.slane %v2892_v1, 2  ;;  %v5501_v16 = vpop.f32.mrb[100].mxu1 }
 0x1b7   : > { %v3335_v28 = vmax.f32 %v3222_v11, %v5501_v16  ;;  %v3302_v17 = vpop.f32.mrb[101].mxu1 }
 0x1b8   : > { %v2894_v35 = vadd.f32 %v2893_v32, %v2892_v1  ;;  %v3333_v22 = vmax.f32 %v3220_v4, %v3302_v17  ;;  %v5502_v58 = vpop.f32.mrb[102].mxu1  ;;  %v6843_v24 = vpop.f32.mrb[92].mxu0  ;;  %v6876_v1 = vld [vmem:[%s7015_s4 + $0x18] sm:$0xff] }
 0x1b9   : > { %v3347_v27 = vsub.f32 %v3335_v28, %v3344_v50  ;;  %v3336_v36 = vmax.f32 %v3223_v0, %v5502_v58  ;;  %v3305_v57 = vpop.f32.mrb[103].mxu1  ;;  %v6845_v37 = vpop.f32.mrb[93].mxu0 }
 0x1ba   : > { %v3345_v46 = vsub.f32 %v3333_v22, %v3344_v50  ;;  %v3334_v10 = vmax.f32 %v3221_v41, %v3305_v57  ;;  %v2895_v2 = vrot.slane %v2894_v35, 1  ;;  %v6847_v6 = vpop.f32.mrb[94].mxu0 }
 0x1bb   : > { %v3359_v29 = vmul.f32 %v3356_v23, %v3347_v27  ;;  %v3348_v33 = vsub.f32 %v3336_v36, %v3344_v50  ;;  %v6853_v0 = vpop.f32.mrb[95].mxu0  ;;  %v6883_v36 = vld [vmem:[%s7015_s4 + $0x20] sm:$0xff] }
 0x1bc   : > { %v3357_v55 = vmul.f32 %v3356_v23, %v3345_v46  ;;  %v3346_v54 = vsub.f32 %v3334_v10, %v3344_v50  ;;  %v2896_v3 = vadd.f32 %v2895_v2, %v2894_v35 }
 0x1bd   : > { %v3360_v5 = vmul.f32 %v3356_v23, %v3348_v33  ;;  %v3367_v19 = vmax.f32 %v3359_v29, 0.0 }
 0x1be   : > { %v3365_v62 = vmax.f32 %v3357_v55, 0.0  ;;  %v3358_v11 = vmul.f32 %v3356_v23, %v3346_v54  ;;  %v5505_v38 = vpop.f32.mrb[104].mxu1  ;;  %v6851_v40 = vsel %vm437_vm0, %v6808_v25, %v2896_v3  ;;  %v6891_v3 = vld [vmem:[%s7015_s4 + $0x28] sm:$0xff] }
 0x1bf   : > { %v3339_v15 = vmax.f32 %v3226_v39, %v5505_v38  ;;  %v3318_v4 = vpop.f32.mrb[105].mxu1  ;;  %v3368_v52 = vmax.f32 %v3360_v5, 0.0  ;;  %v3375_v39 = vmul.f32 %v6870_v60, %v3367_v19 }
 0x1c0   : > { %v3366_v8 = vmax.f32 %v3358_v11, 0.0  ;;  %v3337_v41 = vmax.f32 %v3224_v63, %v3318_v4  ;;  %v5506_v49 = vpop.f32.mrb[106].mxu1  ;;  %v3373_v25 = vmul.f32 %v6858_v30, %v3365_v62  ;;  %v5531_v63 = vpop.f32.mrb[96].mxu0 }
 0x1c1   : > { %v3351_v59 = vsub.f32 %v3339_v15, %v3344_v50  ;;  %v3340_v20 = vmax.f32 %v3227_v48, %v5506_v49  ;;  %v3321_v18 = vpop.f32.mrb[107].mxu1  ;;  %v3686_v48 = vpop.f32.mrb[97].mxu0 }
 0x1c2   : > { %v3374_v53 = vmul.f32 %v6864_v9, %v3366_v8  ;;  %v3349_v45 = vsub.f32 %v3337_v41, %v3344_v50  ;;  %v3338_v21 = vmax.f32 %v3225_v13, %v3321_v18  ;;  %v3376_v13 = vmul.f32 %v6876_v1, %v3368_v52  ;;  %v5532_v35 = vpop.f32.mrb[98].mxu0  ;;  %v6904_v41 = vld [vmem:[%s7015_s4 + $0x38] sm:$0xff] }
 0x1c3   : > { %v3363_v47 = vmul.f32 %v3356_v23, %v3351_v59  ;;  %v3352_v12 = vsub.f32 %v3340_v20, %v3344_v50 }
 0x1c4   : > { %v3381_v61 = vadd.f32 %v3374_v53, %v3373_v25  ;;  %v3361_v42 = vmul.f32 %v3356_v23, %v3349_v45  ;;  %v3350_v56 = vsub.f32 %v3338_v21, %v3344_v50  ;;  %v3689_v50 = vpop.f32.mrb[99].mxu0 }
 0x1c5   : > { %v3364_v14 = vmul.f32 %v3356_v23, %v3352_v12  ;;  %v3371_v22 = vmax.f32 %v3363_v47, 0.0 }
 0x1c6   : > { %v3382_v32 = vadd.f32 %v3381_v61, %v3375_v39  ;;  %v3369_v16 = vmax.f32 %v3361_v42, 0.0  ;;  %v3362_v28 = vmul.f32 %v3356_v23, %v3350_v56  ;;  %v5521_v17 = vpop.f32.mrb[108].mxu1 }
 0x1c7   : > { %v3606_v58 = vmax.f32 %v6833_v43, %v5521_v17  ;;  %v3573_v27 = vpop.f32.mrb[109].mxu1  ;;  %v3372_v23 = vmax.f32 %v3364_v14, 0.0 }
 0x1c8   : > { %v3377_v57 = vmul.f32 %v6883_v36, %v3369_v16  ;;  %v3383_v46 = vadd.f32 %v3382_v32, %v3376_v13  ;;  %v3370_v10 = vmax.f32 %v3362_v28, 0.0  ;;  %v3604_v2 = vmax.f32 %v6835_v7, %v3573_v27  ;;  %v5522_v29 = vpop.f32.mrb[110].mxu1  ;;  %v6898_v7 = vld [vmem:[%s7015_s4 + $0x30] sm:$0xff]  ;;  %v5535_v19 = vpop.f32.mrb[100].mxu0 }
 0x1c9   : > { %v3607_v33 = vmax.f32 %v6837_v34, %v5522_v29  ;;  %v3719_v55 = vmax.f32 %v3606_v58, %v5531_v63  ;;  %v3576_v54 = vpop.f32.mrb[111].mxu1  ;;  %v3379_v34 = vmul.f32 %v6898_v7, %v3371_v22  ;;  %v3702_v8 = vpop.f32.mrb[101].mxu0  ;;  %v3840_v63 = vsub.s32 6, %v6488_v51 }
 0x1ca   : > { %v3384_v43 = vadd.f32 %v3383_v46, %v3377_v57  ;;  %v3378_v5 = vmul.f32 %v6891_v3, %v3370_v10  ;;  %v3605_v62 = vmax.f32 %v6840_v31, %v3576_v54  ;;  %v3717_v11 = vmax.f32 %v3604_v2, %v3686_v48  ;;  %v5536_v59 = vpop.f32.mrb[102].mxu0 }
 0x1cb   : > { %v3720_v38 = vmax.f32 %v3607_v33, %v5532_v35  ;;  %v3380_v31 = vmul.f32 %v6904_v41, %v3372_v23  ;;  %v3705_v25 = vpop.f32.mrb[103].mxu0 }
 0x1cc   : > { %v3385_v15 = vadd.f32 %v3384_v43, %v3378_v5  ;;  %v3718_v4 = vmax.f32 %v3605_v62, %v3689_v50  ;;  %v3853_v50 = vrot.slane %v6519_v26, %v3840_v63 }
 0x1ce   : > { %v3386_v49 = vadd.f32 %v3385_v15, %v3379_v34  ;;  %v5525_v52 = vpop.f32.mrb[112].mxu1 }
 0x1cf   : > { %v3610_v20 = vmax.f32 %v6843_v24, %v5525_v52  ;;  %v3589_v18 = vpop.f32.mrb[113].mxu1 }
 0x1d0   : > { %v3387_v53 = vadd.f32 %v3386_v49, %v3380_v31  ;;  %v3608_v45 = vmax.f32 %v6845_v37, %v3589_v18  ;;  %v5526_v21 = vpop.f32.mrb[114].mxu1  ;;  %v6912_v24 = vpop.f32.mrb[104].mxu0 }
 0x1d1   : > { %v3611_v47 = vmax.f32 %v6847_v6, %v5526_v21  ;;  %v3723_v12 = vmax.f32 %v3610_v20, %v5535_v19  ;;  %v3592_v39 = vpop.f32.mrb[115].mxu1  ;;  %v6914_v32 = vpop.f32.mrb[105].mxu0  ;;  %v3841_v6 = vrot.slane %v6478_v44, %v3840_v63 }
 0x1d2   : > { %v3388_v61 = vrot.slane %v3387_v53, 4  ;;  %v3609_v42 = vmax.f32 %v6853_v0, %v3592_v39  ;;  %v3721_v56 = vmax.f32 %v3608_v45, %v3702_v8  ;;  %v6916_v28 = vpop.f32.mrb[106].mxu0 }
 0x1d3   : > { %v3724_v14 = vmax.f32 %v3611_v47, %v5536_v59  ;;  %v6919_v22 = vpop.f32.mrb[107].mxu0 }
 0x1d4   : > { %v3389_v48 = vadd.f32 %v3388_v61, %v3387_v53  ;;  %v3722_v13 = vmax.f32 %v3609_v42, %v3705_v25 }
 0x1d6   : > { %v3390_v16 = vrot.slane %v3389_v48, 2  ;;  %v5541_v37 = vpop.f32.mrb[116].mxu1 }
 0x1d7   : > { %v3832_v17 = vmax.f32 %v3719_v55, %v5541_v37  ;;  %v3799_v35 = vpop.f32.mrb[117].mxu1 }
 0x1d8   : > { %v3830_v0 = vmax.f32 %v3717_v11, %v3799_v35  ;;  %v5542_v58 = vpop.f32.mrb[118].mxu1  ;;  %v3391_v27 = vadd.f32 %v3390_v16, %v3389_v48  ;;  %v6922_v55 = vpop.f32.mrb[108].mxu0 }
 0x1d9   : > { %v3844_v57 = vsub.f32 %v3832_v17, %v3841_v6  ;;  %v3833_v46 = vmax.f32 %v3720_v38, %v5542_v58  ;;  %v3802_v10 = vpop.f32.mrb[119].mxu1  ;;  %v6924_v11 = vpop.f32.mrb[109].mxu0 }
 0x1da   : > { %v3842_v2 = vsub.f32 %v3830_v0, %v3841_v6  ;;  %v3831_v29 = vmax.f32 %v3718_v4, %v3802_v10  ;;  %v3392_v23 = vrot.slane %v3391_v27, 1  ;;  %v6926_v31 = vpop.f32.mrb[110].mxu0 }
 0x1db   : > { %v3856_v33 = vmul.f32 %v3853_v50, %v3844_v57  ;;  %v3845_v54 = vsub.f32 %v3833_v46, %v3841_v6  ;;  %v6931_v52 = vpop.f32.mrb[111].mxu0 }
 0x1dc   : > { %v3854_v43 = vmul.f32 %v3853_v50, %v3842_v2  ;;  %v3843_v5 = vsub.f32 %v3831_v29, %v3841_v6  ;;  %v3393_v62 = vadd.f32 %v3392_v23, %v3391_v27 }
 0x1dd   : > { %v3857_v34 = vmul.f32 %v3853_v50, %v3845_v54  ;;  %v3864_v59 = vmax.f32 %v3856_v33, 0.0 }
 0x1de   : > { %v3862_v15 = vmax.f32 %v3854_v43, 0.0  ;;  %v3855_v19 = vmul.f32 %v3853_v50, %v3843_v5  ;;  %v5545_v8 = vpop.f32.mrb[120].mxu1  ;;  %v6929_v38 = vsel %vm4395_vm6, %v6851_v40, %v3393_v62 }
 0x1df   : > { %v3836_v4 = vmax.f32 %v3723_v12, %v5545_v8  ;;  %v3815_v49 = vpop.f32.mrb[121].mxu1  ;;  %v3865_v53 = vmax.f32 %v3857_v34, 0.0  ;;  %v3872_v12 = vmul.f32 %v6870_v60, %v3864_v59 }
 0x1e0   : > { %v3863_v20 = vmax.f32 %v3855_v19, 0.0  ;;  %v3834_v18 = vmax.f32 %v3721_v56, %v3815_v49  ;;  %v5546_v25 = vpop.f32.mrb[122].mxu1  ;;  %v3870_v39 = vmul.f32 %v6858_v30, %v3862_v15  ;;  %v5571_v35 = vpop.f32.mrb[112].mxu0 }
 0x1e1   : > { %v3848_v45 = vsub.f32 %v3836_v4, %v3841_v6  ;;  %v3837_v21 = vmax.f32 %v3724_v14, %v5546_v25  ;;  %v3818_v47 = vpop.f32.mrb[123].mxu1  ;;  %v4183_v0 = vpop.f32.mrb[113].mxu0  ;;  %v3873_v58 = vmul.f32 %v6876_v1, %v3865_v53 }
 0x1e2   : > { %v3871_v61 = vmul.f32 %v6864_v9, %v3863_v20  ;;  %v3846_v42 = vsub.f32 %v3834_v18, %v3841_v6  ;;  %v3835_v63 = vmax.f32 %v3722_v13, %v3818_v47  ;;  %v5572_v10 = vpop.f32.mrb[114].mxu0 }
 0x1e3   : > { %v3860_v40 = vmul.f32 %v3853_v50, %v3848_v45  ;;  %v3849_v48 = vsub.f32 %v3837_v21, %v3841_v6  ;;  %v4186_v23 = vpop.f32.mrb[115].mxu0 }
 0x1e4   : > { %v3878_v16 = vadd.f32 %v3871_v61, %v3870_v39  ;;  %v3858_v37 = vmul.f32 %v3853_v50, %v3846_v42  ;;  %v3847_v17 = vsub.f32 %v3835_v63, %v3841_v6 }
 0x1e5   : > { %v3861_v56 = vmul.f32 %v3853_v50, %v3849_v48  ;;  %v3868_v2 = vmax.f32 %v3860_v40, 0.0 }
 0x1e6   : > { %v3879_v14 = vadd.f32 %v3878_v16, %v3872_v12  ;;  %v3866_v27 = vmax.f32 %v3858_v37, 0.0  ;;  %v3859_v57 = vmul.f32 %v3853_v50, %v3847_v17  ;;  %v5561_v46 = vpop.f32.mrb[124].mxu1 }
 0x1e7   : > { %v4103_v13 = vmax.f32 %v6912_v24, %v5561_v46  ;;  %v4070_v29 = vpop.f32.mrb[125].mxu1  ;;  %v3869_v62 = vmax.f32 %v3861_v56, 0.0  ;;  %v3876_v59 = vmul.f32 %v6898_v7, %v3868_v2 }
 0x1e8   : > { %v3874_v33 = vmul.f32 %v6883_v36, %v3866_v27  ;;  %v3880_v54 = vadd.f32 %v3879_v14, %v3873_v58  ;;  %v3867_v43 = vmax.f32 %v3859_v57, 0.0  ;;  %v4101_v6 = vmax.f32 %v6914_v32, %v4070_v29  ;;  %v5562_v5 = vpop.f32.mrb[126].mxu1  ;;  %v5575_v25 = vpop.f32.mrb[116].mxu0 }
 0x1e9   : > { %v4104_v34 = vmax.f32 %v6916_v28, %v5562_v5  ;;  %v4216_v15 = vmax.f32 %v4103_v13, %v5571_v35  ;;  %v4073_v19 = vpop.f32.mrb[127].mxu1  ;;  %v4199_v53 = vpop.f32.mrb[117].mxu0  ;;  %v3877_v32 = vmul.f32 %v6904_v41, %v3869_v62  ;;  %v4337_v35 = vsub.s32 7, %v6488_v51 }
 0x1ea   : > { %v3881_v50 = vadd.f32 %v3880_v54, %v3874_v33  ;;  %v3875_v8 = vmul.f32 %v6891_v3, %v3867_v43  ;;  %v4102_v4 = vmax.f32 %v6919_v22, %v4073_v19  ;;  %v4214_v24 = vmax.f32 %v4101_v6, %v4183_v0  ;;  %v5576_v28 = vpop.f32.mrb[118].mxu0 }
 0x1eb   : > { %v4217_v49 = vmax.f32 %v4104_v34, %v5572_v10  ;;  %v4202_v61 = vpop.f32.mrb[119].mxu0  ;;  %v4338_v27 = vrot.slane %v6478_v44, %v4337_v35  ;;  %v4350_v2 = vrot.slane %v6519_v26, %v4337_v35 }
 0x1ec   : > { %v3882_v20 = vadd.f32 %v3881_v50, %v3875_v8  ;;  %v4215_v18 = vmax.f32 %v4102_v4, %v4186_v23 }
 0x1ee   : > { %v3883_v45 = vadd.f32 %v3882_v20, %v3876_v59  ;;  %v5565_v21 = vpop.f32.mrb[128].mxu1 }
 0x1ef   : > { %v4107_v47 = vmax.f32 %v6922_v55, %v5565_v21  ;;  %v4086_v39 = vpop.f32.mrb[129].mxu1 }
 0x1f0   : > { %v3884_v42 = vadd.f32 %v3883_v45, %v3877_v32  ;;  %v4105_v22 = vmax.f32 %v6924_v11, %v4086_v39  ;;  %v5566_v63 = vpop.f32.mrb[130].mxu1 }
 0x1f1   : > { %v4108_v40 = vmax.f32 %v6926_v31, %v5566_v63  ;;  %v4220_v48 = vmax.f32 %v4107_v47, %v5575_v25  ;;  %v4089_v12 = vpop.f32.mrb[131].mxu1 }
 0x1f2   : > { %v3885_v16 = vrot.slane %v3884_v42, 4  ;;  %v4106_v37 = vmax.f32 %v6931_v52, %v4089_v12  ;;  %v4218_v17 = vmax.f32 %v4105_v22, %v4199_v53 }
 0x1f3   : > { %v4221_v56 = vmax.f32 %v4108_v40, %v5576_v28 }
 0x1f4   : > { %v3886_v0 = vadd.f32 %v3885_v16, %v3884_v42  ;;  %v4219_v58 = vmax.f32 %v4106_v37, %v4202_v61 }
 0x1f6   : > { %v5581_v55 = vpop.f32.mrb[132].mxu1  ;;  %v3887_v14 = vrot.slane %v3886_v0, 2 }
 0x1f7   : > { %v4329_v57 = vmax.f32 %v4216_v15, %v5581_v55  ;;  %v4296_v11 = vpop.f32.mrb[133].mxu1 }
 0x1f8   : > { %v4327_v46 = vmax.f32 %v4214_v24, %v4296_v11  ;;  %v5582_v10 = vpop.f32.mrb[134].mxu1  ;;  %v3888_v31 = vadd.f32 %v3887_v14, %v3886_v0 }
 0x1f9   : > { %v4341_v13 = vsub.f32 %v4329_v57, %v4338_v27  ;;  %v4330_v29 = vmax.f32 %v4217_v49, %v5582_v10  ;;  %v4299_v52 = vpop.f32.mrb[135].mxu1 }
 0x1fa   : > { %v4339_v23 = vsub.f32 %v4327_v46, %v4338_v27  ;;  %v4328_v33 = vmax.f32 %v4215_v18, %v4299_v52  ;;  %v3889_v51 = vrot.slane %v3888_v31, 1 }
 0x1fb   : > { %v4353_v54 = vmul.f32 %v4350_v2, %v4341_v13  ;;  %v4342_v43 = vsub.f32 %v4330_v29, %v4338_v27 }
 0x1fc   : > { %v4351_v6 = vmul.f32 %v4350_v2, %v4339_v23  ;;  %v4340_v5 = vsub.f32 %v4328_v33, %v4338_v27  ;;  %v3890_v62 = vadd.f32 %v3889_v51, %v3888_v31 }
 0x1fd   : > { %v4354_v44 = vmul.f32 %v4350_v2, %v4342_v43  ;;  %v4361_v4 = vmax.f32 %v4353_v54, 0.0 }
 0x1fe   : > { %v4359_v34 = vmax.f32 %v4351_v6, 0.0  ;;  %v4352_v15 = vmul.f32 %v4350_v2, %v4340_v5  ;;  %v5585_v19 = vpop.f32.mrb[136].mxu1  ;;  %v4398_v50 = vsel %vm4397_vm7, %v6929_v38, %v3890_v62 }
 0x1ff   : > { %v4333_v8 = vmax.f32 %v4220_v48, %v5585_v19  ;;  %v4312_v26 = vpop.f32.mrb[137].mxu1  ;;  %v4362_v20 = vmax.f32 %v4354_v44, 0.0  ;;  %v4369_v38 = vmul.f32 %v6870_v60, %v4361_v4 }
 0x200   : > { %v4360_v24 = vmax.f32 %v4352_v15, 0.0  ;;  %v4331_v49 = vmax.f32 %v4218_v17, %v4312_v26  ;;  %v5586_v59 = vpop.f32.mrb[138].mxu1  ;;  %v4367_v32 = vmul.f32 %v6858_v30, %v4359_v34 }
 0x201   : > { %v4345_v18 = vsub.f32 %v4333_v8, %v4338_v27  ;;  %v4334_v25 = vmax.f32 %v4221_v56, %v5586_v59  ;;  %v4315_v53 = vpop.f32.mrb[139].mxu1  ;;  %v4370_v40 = vmul.f32 %v6876_v1, %v4362_v20 }
 0x202   : > { %v4368_v45 = vmul.f32 %v6864_v9, %v4360_v24  ;;  %v4343_v21 = vsub.f32 %v4331_v49, %v4338_v27  ;;  %v4332_v28 = vmax.f32 %v4219_v58, %v4315_v53 }
 0x203   : > { %v4357_v47 = vmul.f32 %v4350_v2, %v4345_v18  ;;  %v4346_v39 = vsub.f32 %v4334_v25, %v4338_v27 }
 0x204   : > { %v4375_v61 = vadd.f32 %v4368_v45, %v4367_v32  ;;  %v4355_v42 = vmul.f32 %v4350_v2, %v4343_v21  ;;  %v4344_v22 = vsub.f32 %v4332_v28, %v4338_v27 }
 0x205   : > { %v4358_v63 = vmul.f32 %v4350_v2, %v4346_v39  ;;  %v4365_v37 = vmax.f32 %v4357_v47, 0.0 }
 0x206   : > { %v4376_v48 = vadd.f32 %v4375_v61, %v4369_v38  ;;  %v4363_v12 = vmax.f32 %v4355_v42, 0.0  ;;  %v4356_v16 = vmul.f32 %v4350_v2, %v4344_v22 }
 0x207   : > { %v4366_v56 = vmax.f32 %v4358_v63, 0.0  ;;  %v4373_v60 = vmul.f32 %v6898_v7, %v4365_v37 }
 0x208   : > { %v4371_v30 = vmul.f32 %v6883_v36, %v4363_v12  ;;  %v4377_v17 = vadd.f32 %v4376_v48, %v4370_v40  ;;  %v4364_v9 = vmax.f32 %v4356_v16, 0.0 }
 0x209   : > { %v4374_v55 = vmul.f32 %v6904_v41, %v4366_v56 }
 0x20a   : > { %v4378_v35 = vadd.f32 %v4377_v17, %v4371_v30  ;;  %v4372_v0 = vmul.f32 %v6891_v3, %v4364_v9  ;;  %v4417_v3 = vld [vmem:[%s7017_s6] sm:$0xff] }
 0x20c   : > { %v4379_v58 = vadd.f32 %v4378_v35, %v4372_v0 }
 0x20e   : > { %v4380_v1 = vadd.f32 %v4379_v58, %v4373_v60 }
 0x210   : > { %v4381_v14 = vadd.f32 %v4380_v1, %v4374_v55 }
 0x212   : > { %v4382_v27 = vrot.slane %v4381_v14, 4 }
 0x214   : > { %v4383_v57 = vadd.f32 %v4382_v27, %v4381_v14 }
 0x216   : > { %v4384_v11 = vrot.slane %v4383_v57, 2 }
 0x218   : > { %v4385_v46 = vadd.f32 %v4384_v11, %v4383_v57 }
 0x21a   : > { %v4386_v36 = vrot.slane %v4385_v46, 1 }
 0x21c   : > { %v4387_v10 = vadd.f32 %v4386_v36, %v4385_v46 }
 0x21e   : > { %v4400_v31 = vsel %vm4399_vm8, %v4398_v50, %v4387_v10 }
 0x21f   : > { %5620 = vmatmul.mubr.f32.vlgmr.msra.gmra.mrb[2].mxu0 %v4400_v31 }
 0x2f2   : > { %v4484_v7 = vpop.f32.mrb[2].mxu0 }
 0x2f3   : > { %v4485_v41 = vadd.f32 %v4484_v7, %v4417_v3  ;;  %v5621_v2 = vpop.f32.mrb[3].mxu0 }
 0x2f5   : > { %4488 = vst [vmem:[%s286_s18] sm:$0xff] %v4485_v41 }
 0x2f6   : > { %5907 = shalt.err (!%p5904_p3)
}
 0x2f7   : > { %s5908_s13 = scalar_lea.hbm %s6969_s21, 128  ;;  %s5912_s15 = scalar_lea.hbm %s7018_s7, 256 }
 0x2f8   : > { %p5909_p4 = scmp.ne.s32.totalorder %s6969_s21, %s5908_s13  ;;  %p5913_p9 = scmp.lt.u32.totalorder %s6969_s21, %s7018_s7 }
 0x2f9   : > { %p5914_p10 = scmp.lt.u32.totalorder %s5912_s15, %s5908_s13  ;;  %p5916_p12 = scmp.lt.u32.totalorder %s5908_s13, %s6969_s21 }
 0x2fa   : > { %p5910_p7 = pnand %p5909_p4, %p6040_p5 }
 0x2fb   : > { %p5915_p11 = por %p5914_p10, %p5913_p9 }
 0x2fc   : > { %p5911_p8 = pneg %p5910_p7 }
 0x2fd   : > { %p5917_p13 = por %p5916_p12, %p5915_p11 }
 0x2ff   : > { %p5918_p0 = pnand %p5917_p13, %p5911_p8 }
 0x301   : > { %5921 = shalt.err (!%p5918_p0)
}
 0x302   : > { %5713 = dma.vmem_to_hbm [thread:$0]  (%p6040_p5), %s6971_s17, 128, %s6969_s21, %s4490_s22  }
 0x303 PF: > { %p5719_p1 = scmp.ge.s32.totalorder %s5956_s27, 2  ;;  %s4515_s19 = sand.u32 1, %s5944_s24  }
 0x304   : > { %s4516_s20 = scalar_lea.sflag [#allocation3], %s4515_s19 }
 0x305   : > { %p5716_p2 = pnand %p5719_p1, %p6044_p6 }
 0x307   : > { %5939 = dma.done.wait (!%p5716_p2), %s4516_s20, 128  }
 0x308   : > { %5941 = vsyncadd (!%p5716_p2), %s4516_s20, 4294967168  ;;  %p17_p3 = scmp.ge.s32.totalorder %s6027_s30, 4   ;;  %s7021_s24 = smov %s5948_s25 }
 0x309   : > { %s7022_s25 = smov %s5952_s26  ;;  %s7023_s26 = smov %s6038_s10 }
 0x30a   : > { %s7024_s27 = smov %s6027_s30  ;;  %19 = sbr.rel (!%p17_p3) target bundleno = 3 (0x3), region = 89 }
 0x311   :  { %4521 = vsyncpa [#allocation3], 1 }
 0x312   :  { %4523 = vsyncpa [#allocation3 + $0x1], 1 }

</bundles_post_ra>
